<compile_context>
chip_gen: v5e
topology: v5e:2x2
jax: 0.10.0
libtpu: 0.0.40
codegen_flags: <defaults>
</compile_context>

<pallas_src>
import math

import jax
import jax.numpy as jnp
from jax import lax
from jax.experimental import pallas as pl
from jax.experimental.pallas import tpu as pltpu

# ----------------------------- model hyperparameters -----------------------------
B, T = 2, 8            # batch, sequence length
D = 32                 # n_embd
H = 4                  # n_head
HD = D // H            # head dim
L = 2                  # n_layer (kept small for the demo)
FF = 4 * D             # GPT-2 MLP inner dim
VOCAB = 100            # synthetic vocab (stands in for the pretrained wte)
N_POS = 16             # 2 * n_positions, n_positions = 8
EPS = 1e-5             # GPT-2 layer_norm_epsilon
NEG_INF = -1e9
NUM_CLASSES = 2


# ----------------------------- shared math helpers --------------------------------
def _norm(x):
    """LayerNorm without affine (gamma/beta are folded into the next matmul)."""
    mu = jnp.mean(x, axis=-1, keepdims=True)
    var = jnp.mean((x - mu) ** 2, axis=-1, keepdims=True)
    return (x - mu) * lax.rsqrt(var + EPS)


def _layernorm(x, g, b):
    return _norm(x) * g + b


def _gelu_new(x):
    # GPT-2 "gelu_new" (tanh approximation)
    return 0.5 * x * (1.0 + jnp.tanh(math.sqrt(2.0 / math.pi) * (x + 0.044715 * x * x * x)))


# ----------------------------- the fused Pallas kernel -----------------------------
def gpt2_cls_kernel(ids_ref, wte_ref, wpe_ref,
                    wqkv_ref, bqkv_ref, wproj_ref, bproj_ref,
                    wfc_ref, bfc_ref, wout_ref, bout_ref,
                    wc_ref, bc_ref, logits_ref):
    """One grid step == one sequence (grid=(B,), 'parallel' -> both v7x TCs busy)."""
    f32 = jnp.float32
    bf16 = jnp.bfloat16

    # ---- embeddings fused in-kernel: gather == one-hot @ table on the MXU ----
    ids = ids_ref[0]                                                   # [T, 1] int32
    tok_oh = (ids == lax.broadcasted_iota(jnp.int32, (T, VOCAB), 1)).astype(f32)
    h = jnp.dot(tok_oh, wte_ref[...], preferred_element_type=f32)      # [T, D]
    pos = lax.broadcasted_iota(jnp.int32, (T, 1), 0)
    pos_oh = (pos == lax.broadcasted_iota(jnp.int32, (T, N_POS), 1)).astype(f32)
    h = h + jnp.dot(pos_oh, wpe_ref[...], preferred_element_type=f32)  # [T, D]

    # additive causal-mask bias, built once per grid step
    row = lax.broadcasted_iota(jnp.int32, (T, T), 0)
    col = lax.broadcasted_iota(jnp.int32, (T, T), 1)
    mask_bias = jnp.where(col <= row, 0.0, NEG_INF).astype(f32)[None, :, :]   # [1, T, T]
    inv_sqrt_hd = 1.0 / math.sqrt(HD)

    # TODO(synk): at real GPT-2 sizes (L=12, D=768) switch to lax.fori_loop + a layer
    # grid axis with pl.Buffered(2) weight BlockSpecs (v7x VMEM budget is 64 MiB).
    for l in range(L):                                                 # static unroll, L tiny
        # ---------- attention (ln1 gamma/beta folded into wqkv/bqkv) ----------
        qkv = jnp.dot(_norm(h).astype(bf16), wqkv_ref[l],
                      preferred_element_type=f32) + bqkv_ref[l]        # [T, 3D] f32
        # single layout op instead of per-head lane slices + concats
        qkvh = pltpu.einshape("tcd->ctd", qkv.reshape(T, 3 * H, HD))   # [3H, T, HD]
        qh = qkvh[:H].astype(bf16)                                     # [H, T, HD]
        kh = qkvh[H:2 * H].astype(bf16)
        vh = qkvh[2 * H:].astype(bf16)

        s = jnp.einsum('htd,hsd->hts', qh, kh,
                       preferred_element_type=f32) * inv_sqrt_hd + mask_bias
        s = s - jnp.max(s, axis=-1, keepdims=True)
        p = jnp.exp(s)                                                 # f32 softmax math
        p = p * pl.reciprocal(jnp.sum(p, axis=-1, keepdims=True), approx=True)
        o = jnp.einsum('hts,hsd->htd', p.astype(bf16), vh,
                       preferred_element_type=f32)                     # [H, T, HD]

        attn = pltpu.einshape("htd->thd", o).reshape(T, D)             # [T, D]
        h = h + jnp.dot(attn.astype(bf16), wproj_ref[l],
                        preferred_element_type=f32) + bproj_ref[l]

        # ---------- MLP (ln2 gamma/beta folded into wfc/bfc) ----------
        ff = _gelu_new(jnp.dot(_norm(h).astype(bf16), wfc_ref[l],
                               preferred_element_type=f32) + bfc_ref[l])
        h = h + jnp.dot(ff.astype(bf16), wout_ref[l],
                        preferred_element_type=f32) + bout_ref[l]

    # ---------- classification head: final LN (folded into wc/bc) on token 0, f32 ----------
    x0 = _norm(h[0:1, :])                                              # [1, D]
    logits_ref[...] = (jnp.dot(x0, wc_ref[...], preferred_element_type=f32)
                       + bc_ref[...]).reshape(1, 1, NUM_CLASSES)


# ----------------------------- parameters ------------------------------------------
def init_params(key):
    ks = jax.random.split(key, 12)
    s = 0.02
    return dict(
        wte=jax.random.normal(ks[0], (VOCAB, D), jnp.float32) * s,
        wpe=jax.random.normal(ks[1], (N_POS, D), jnp.float32) * s,
        ln1_g=1.0 + 0.1 * jax.random.normal(ks[7], (L, 1, D), jnp.float32),
        ln1_b=0.02 * jax.random.normal(ks[8], (L, 1, D), jnp.float32),
        wqkv=jax.random.normal(ks[2], (L, D, 3 * D), jnp.float32) * s,
        bqkv=jnp.zeros((L, 1, 3 * D), jnp.float32),
        wproj=jax.random.normal(ks[3], (L, D, D), jnp.float32) * s,
        bproj=jnp.zeros((L, 1, D), jnp.float32),
        ln2_g=1.0 + 0.1 * jax.random.normal(ks[9], (L, 1, D), jnp.float32),
        ln2_b=0.02 * jax.random.normal(ks[10], (L, 1, D), jnp.float32),
        wfc=jax.random.normal(ks[4], (L, D, FF), jnp.float32) * s,
        bfc=jnp.zeros((L, 1, FF), jnp.float32),
        wout=jax.random.normal(ks[5], (L, FF, D), jnp.float32) * s,
        bout=jnp.zeros((L, 1, D), jnp.float32),
        lnf_g=1.0 + 0.1 * jax.random.normal(ks[11], (1, D), jnp.float32),
        lnf_b=jnp.zeros((1, D), jnp.float32),
        wc=jax.random.normal(ks[6], (D, NUM_CLASSES), jnp.float32) * s,
        bc=jnp.zeros((1, NUM_CLASSES), jnp.float32),
    )


def fold_params(p):
    """LN folding:  LN(x) @ W + c == norm(x) @ (g[:,None]*W) + (b_ln @ W + c).
    Per-layer matmul weights are cast to bf16 once here (bf16-native MXU on v6e/v7x,
    f32 accumulation); embedding tables and the classifier weights stay f32."""
    bf16 = jnp.bfloat16
    wqkv_f = (jnp.swapaxes(p['ln1_g'], 1, 2) * p['wqkv']).astype(bf16)   # (L, D, 3D)
    bqkv_f = jnp.matmul(p['ln1_b'], p['wqkv']) + p['bqkv']               # (L, 1, 3D) f32
    wfc_f = (jnp.swapaxes(p['ln2_g'], 1, 2) * p['wfc']).astype(bf16)     # (L, D, FF)
    bfc_f = jnp.matmul(p['ln2_b'], p['wfc']) + p['bfc']                  # (L, 1, FF) f32
    wc_f = p['lnf_g'].reshape(D, 1) * p['wc']                            # (D, 2) f32
    bc_f = p['lnf_b'] @ p['wc'] + p['bc']                                # (1, 2) f32
    return dict(wte=p['wte'], wpe=p['wpe'],
                wqkv_f=wqkv_f, bqkv_f=bqkv_f,
                wproj=p['wproj'].astype(bf16), bproj=p['bproj'],
                wfc_f=wfc_f, bfc_f=bfc_f,
                wout=p['wout'].astype(bf16), bout=p['bout'],
                wc_f=wc_f, bc_f=bc_f)


# ----------------------------- forward ---------------------------------------------
@jax.jit
def forward(kparams, input_ids, labels=None):
    # TODO(synk): attention_mask / padding support is not handled (full causal attention only).
    ids = input_ids.reshape(B, T, 1).astype(jnp.int32)

    vmem = pl.BlockSpec(memory_space=pltpu.MemorySpace.VMEM)   # whole array resident in VMEM
    logits3 = pl.pallas_call(
        gpt2_cls_kernel,
        grid=(B,),
        out_shape=jax.ShapeDtypeStruct((B, 1, NUM_CLASSES), jnp.float32),
        in_specs=[pl.BlockSpec((1, T, 1), lambda b: (b, 0, 0))] + [vmem] * 12,
        out_specs=pl.BlockSpec((1, 1, NUM_CLASSES), lambda b: (b, 0, 0)),
        compiler_params=pltpu.CompilerParams(dimension_semantics=("parallel",)),
    )(ids, kparams['wte'], kparams['wpe'],
      kparams['wqkv_f'], kparams['bqkv_f'], kparams['wproj'], kparams['bproj'],
      kparams['wfc_f'], kparams['bfc_f'], kparams['wout'], kparams['bout'],
      kparams['wc_f'], kparams['bc_f'])
    logits = logits3.reshape(B, NUM_CLASSES)

    if labels is None:
        return logits
    logz = jax.nn.log_softmax(logits, axis=-1)
    nll = -jnp.take_along_axis(logz, labels[:, None], axis=-1)[:, 0]
    return jnp.mean(nll), logits


# ----------------------------- pure-JAX reference -----------------------------------
def reference_logits(params, input_ids):
    h = params['wte'][input_ids] + params['wpe'][jnp.arange(T)][None, :, :]
    row = lax.broadcasted_iota(jnp.int32, (T, T), 0)
    col = lax.broadcasted_iota(jnp.int32, (T, T), 1)
    causal = (col <= row)[None, None, :, :]
    for l in range(L):
        x = _layernorm(h, params['ln1_g'][l], params['ln1_b'][l])
        qkv = x @ params['wqkv'][l] + params['bqkv'][l]
        q, k, v = jnp.split(qkv, 3, axis=-1)
        q = q.reshape(B, T, H, HD)
        k = k.reshape(B, T, H, HD)
        v = v.reshape(B, T, H, HD)
        s = jnp.einsum('bthd,bshd->bhts', q, k) / math.sqrt(HD)
        s = jnp.where(causal, s, NEG_INF)
        p = jax.nn.softmax(s, axis=-1)
        o = jnp.einsum('bhts,bshd->bthd', p, v).reshape(B, T, D)
        h = h + o @ params['wproj'][l] + params['bproj'][l]
        x2 = _layernorm(h, params['ln2_g'][l], params['ln2_b'][l])
        ff = _gelu_new(x2 @ params['wfc'][l] + params['bfc'][l])
        h = h + ff @ params['wout'][l] + params['bout'][l]
    x0 = _layernorm(h[:, 0, :], params['lnf_g'], params['lnf_b'])
    return x0 @ params['wc'] + params['bc']


# ----------------------------- main --------------------------------------------------
if __name__ == "__main__":
    key = jax.random.PRNGKey(0)
    kp, ki, kl = jax.random.split(key, 3)
    params = init_params(kp)
    kparams = fold_params(params)          # one-time LN-folding + bf16 weight transform
    input_ids = jax.random.randint(ki, (B, T), 0, VOCAB)
    labels = jax.random.randint(kl, (B,), 0, NUM_CLASSES)

    loss, logits = forward(kparams, input_ids, labels)
    jax.block_until_ready((loss, logits))

    ref = reference_logits(params, input_ids)
    assert logits.shape == (B, NUM_CLASSES)
    # bf16 MXU operands in the kernel vs. exact-f32 reference -> slightly loosened tolerance
    assert jnp.allclose(logits, ref, atol=1e-2, rtol=1e-2), (logits, ref)
    assert jnp.isfinite(loss)

    print("KERNEL_OK")
</pallas_src>

<mosaic_0001>
module attributes {stable_mosaic.version = 11 : i64} {
  func.func @gpt2_cls_kernel(%arg0: i32, %arg1: memref<1x8x1xi32, #tpu.memory_space<vmem>>, %arg2: memref<100x32xf32, #tpu.memory_space<vmem>>, %arg3: memref<16x32xf32, #tpu.memory_space<vmem>>, %arg4: memref<2x32x96xbf16, #tpu.memory_space<vmem>>, %arg5: memref<2x1x96xf32, #tpu.memory_space<vmem>>, %arg6: memref<2x32x32xbf16, #tpu.memory_space<vmem>>, %arg7: memref<2x1x32xf32, #tpu.memory_space<vmem>>, %arg8: memref<2x32x128xbf16, #tpu.memory_space<vmem>>, %arg9: memref<2x1x128xf32, #tpu.memory_space<vmem>>, %arg10: memref<2x128x32xbf16, #tpu.memory_space<vmem>>, %arg11: memref<2x1x32xf32, #tpu.memory_space<vmem>>, %arg12: memref<32x2xf32, #tpu.memory_space<vmem>>, %arg13: memref<1x2xf32, #tpu.memory_space<vmem>>, %arg14: memref<1x1x2xf32, #tpu.memory_space<vmem>>) attributes {dimension_semantics = [#tpu.dimension_semantics<parallel>], iteration_bounds = array<i64: 2>, scalar_prefetch = 0 : i64, scratch_operands = 0 : i64, tpu.core_type = #tpu.core_type<tc>, window_params = [{transform_indices = @transform_0, window_bounds = array<i64: 1, 8, 1>}, {pipeline_mode = #tpu.pipeline_mode<synchronous>, transform_indices = @transform_1, window_bounds = array<i64: 100, 32>}, {pipeline_mode = #tpu.pipeline_mode<synchronous>, transform_indices = @transform_2, window_bounds = array<i64: 16, 32>}, {pipeline_mode = #tpu.pipeline_mode<synchronous>, transform_indices = @transform_3, window_bounds = array<i64: 2, 32, 96>}, {pipeline_mode = #tpu.pipeline_mode<synchronous>, transform_indices = @transform_4, window_bounds = array<i64: 2, 1, 96>}, {pipeline_mode = #tpu.pipeline_mode<synchronous>, transform_indices = @transform_5, window_bounds = array<i64: 2, 32, 32>}, {pipeline_mode = #tpu.pipeline_mode<synchronous>, transform_indices = @transform_6, window_bounds = array<i64: 2, 1, 32>}, {pipeline_mode = #tpu.pipeline_mode<synchronous>, transform_indices = @transform_7, window_bounds = array<i64: 2, 32, 128>}, {pipeline_mode = #tpu.pipeline_mode<synchronous>, transform_indices = @transform_8, window_bounds = array<i64: 2, 1, 128>}, {pipeline_mode = #tpu.pipeline_mode<synchronous>, transform_indices = @transform_9, window_bounds = array<i64: 2, 128, 32>}, {pipeline_mode = #tpu.pipeline_mode<synchronous>, transform_indices = @transform_10, window_bounds = array<i64: 2, 1, 32>}, {pipeline_mode = #tpu.pipeline_mode<synchronous>, transform_indices = @transform_11, window_bounds = array<i64: 32, 2>}, {pipeline_mode = #tpu.pipeline_mode<synchronous>, transform_indices = @transform_12, window_bounds = array<i64: 1, 2>}, {transform_indices = @transform_13, window_bounds = array<i64: 1, 1, 2>}]} {
    %c0 = arith.constant 0 : index
    %c0_0 = arith.constant 0 : index
    %c0_1 = arith.constant 0 : index
    %0 = vector.load %arg1[%c0, %c0_0, %c0_1] : memref<1x8x1xi32, #tpu.memory_space<vmem>>, vector<1x8x1xi32>
    %1 = vector.shape_cast %0 : vector<1x8x1xi32> to vector<8x1xi32>
    %2 = tpu.iota {dimensions = array<i32: 1>} : vector<8x100xi32>
    %3 = vector.broadcast %1 : vector<8x1xi32> to vector<8x100xi32>
    %4 = arith.cmpi eq, %3, %2 : vector<8x100xi32>
    %5 = arith.extui %4 : vector<8x100xi1> to vector<8x100xi32>
    %6 = arith.sitofp %5 : vector<8x100xi32> to vector<8x100xf32>
    %c0_2 = arith.constant 0 : index
    %c0_3 = arith.constant 0 : index
    %7 = vector.load %arg2[%c0_2, %c0_3] : memref<100x32xf32, #tpu.memory_space<vmem>>, vector<100x32xf32>
    %cst = arith.constant dense<0.000000e+00> : vector<8x32xf32>
    %8 = tpu.matmul %6, %7, %cst {dimension_numbers = #tpu.dot_dimension_numbers<[1], [0], [0], [1], [0, 0, 1, 1], [], []>} : vector<8x100xf32>, vector<100x32xf32>, vector<8x32xf32> -> vector<8x32xf32>
    %9 = tpu.iota {dimensions = array<i32: 0>} : vector<8x1xi32>
    %10 = tpu.iota {dimensions = array<i32: 1>} : vector<8x16xi32>
    %11 = vector.broadcast %9 : vector<8x1xi32> to vector<8x16xi32>
    %12 = arith.cmpi eq, %11, %10 : vector<8x16xi32>
    %13 = arith.extui %12 : vector<8x16xi1> to vector<8x16xi32>
    %14 = arith.sitofp %13 : vector<8x16xi32> to vector<8x16xf32>
    %c0_4 = arith.constant 0 : index
    %c0_5 = arith.constant 0 : index
    %15 = vector.load %arg3[%c0_4, %c0_5] : memref<16x32xf32, #tpu.memory_space<vmem>>, vector<16x32xf32>
    %cst_6 = arith.constant dense<0.000000e+00> : vector<8x32xf32>
    %16 = tpu.matmul %14, %15, %cst_6 {dimension_numbers = #tpu.dot_dimension_numbers<[1], [0], [0], [1], [0, 0, 1, 1], [], []>} : vector<8x16xf32>, vector<16x32xf32>, vector<8x32xf32> -> vector<8x32xf32>
    %17 = arith.addf %8, %16 : vector<8x32xf32>
    %18 = tpu.iota {dimensions = array<i32: 0>} : vector<8x8xi32>
    %19 = tpu.iota {dimensions = array<i32: 1>} : vector<8x8xi32>
    %20 = arith.cmpi sle, %19, %18 : vector<8x8xi32>
    %cst_7 = arith.constant 0.000000e+00 : f32
    %cst_8 = arith.constant -1.000000e+09 : f32
    %21 = vector.broadcast %cst_7 : f32 to vector<8x8xf32>
    %22 = vector.broadcast %cst_8 : f32 to vector<8x8xf32>
    %23 = arith.select %20, %21, %22 : vector<8x8xi1>, vector<8x8xf32>
    %24 = vector.shape_cast %23 : vector<8x8xf32> to vector<1x8x8xf32>
    %cst_9 = arith.constant dense<0.000000e+00> : vector<8xf32>
    %25 = vector.multi_reduction <add>, %17, %cst_9 [1] : vector<8x32xf32> to vector<8xf32>
    %26 = vector.shape_cast %25 : vector<8xf32> to vector<8x1xf32>
    %cst_10 = arith.constant 3.200000e+01 : f32
    %27 = vector.broadcast %cst_10 : f32 to vector<8x1xf32>
    %28 = arith.divf %26, %27 : vector<8x1xf32>
    %29 = vector.broadcast %28 : vector<8x1xf32> to vector<8x32xf32>
    %30 = arith.subf %17, %29 : vector<8x32xf32>
    %31 = arith.mulf %30, %30 : vector<8x32xf32>
    %cst_11 = arith.constant dense<0.000000e+00> : vector<8xf32>
    %32 = vector.multi_reduction <add>, %31, %cst_11 [1] : vector<8x32xf32> to vector<8xf32>
    %33 = vector.shape_cast %32 : vector<8xf32> to vector<8x1xf32>
    %cst_12 = arith.constant 3.200000e+01 : f32
    %34 = vector.broadcast %cst_12 : f32 to vector<8x1xf32>
    %35 = arith.divf %33, %34 : vector<8x1xf32>
    %36 = vector.broadcast %28 : vector<8x1xf32> to vector<8x32xf32>
    %37 = arith.subf %17, %36 : vector<8x32xf32>
    %cst_13 = arith.constant 9.99999974E-6 : f32
    %38 = vector.broadcast %cst_13 : f32 to vector<8x1xf32>
    %39 = arith.addf %35, %38 : vector<8x1xf32>
    %40 = math.rsqrt %39 : vector<8x1xf32>
    %41 = vector.broadcast %40 : vector<8x1xf32> to vector<8x32xf32>
    %42 = arith.mulf %37, %41 : vector<8x32xf32>
    %43 = arith.truncf %42 : vector<8x32xf32> to vector<8x32xbf16>
    %c0_14 = arith.constant 0 : index
    %c0_15 = arith.constant 0 : index
    %c0_16 = arith.constant 0 : index
    %44 = vector.load %arg4[%c0_14, %c0_15, %c0_16] : memref<2x32x96xbf16, #tpu.memory_space<vmem>>, vector<1x32x96xbf16>
    %45 = vector.shape_cast %44 : vector<1x32x96xbf16> to vector<32x96xbf16>
    %cst_17 = arith.constant dense<0.000000e+00> : vector<8x96xf32>
    %46 = tpu.matmul %43, %45, %cst_17 {dimension_numbers = #tpu.dot_dimension_numbers<[1], [0], [0], [1], [0, 0, 1, 1], [], []>} : vector<8x32xbf16>, vector<32x96xbf16>, vector<8x96xf32> -> vector<8x96xf32>
    %c0_18 = arith.constant 0 : index
    %c0_19 = arith.constant 0 : index
    %c0_20 = arith.constant 0 : index
    %47 = vector.load %arg5[%c0_18, %c0_19, %c0_20] : memref<2x1x96xf32, #tpu.memory_space<vmem>>, vector<1x1x96xf32>
    %48 = vector.shape_cast %47 : vector<1x1x96xf32> to vector<1x96xf32>
    %49 = vector.broadcast %48 : vector<1x96xf32> to vector<8x96xf32>
    %50 = arith.addf %46, %49 : vector<8x96xf32>
    %51 = vector.shape_cast %50 : vector<8x96xf32> to vector<8x12x8xf32>
    %52 = tpu.transpose %51, [1, 0, 2] : vector<8x12x8xf32> -> vector<12x8x8xf32>
    %53 = vector.extract_strided_slice %52 {offsets = [0, 0, 0], sizes = [4, 8, 8], strides = [1, 1, 1]} : vector<12x8x8xf32> to vector<4x8x8xf32>
    %54 = arith.truncf %53 : vector<4x8x8xf32> to vector<4x8x8xbf16>
    %55 = vector.extract_strided_slice %52 {offsets = [4, 0, 0], sizes = [4, 8, 8], strides = [1, 1, 1]} : vector<12x8x8xf32> to vector<4x8x8xf32>
    %56 = arith.truncf %55 : vector<4x8x8xf32> to vector<4x8x8xbf16>
    %57 = vector.extract_strided_slice %52 {offsets = [8, 0, 0], sizes = [4, 8, 8], strides = [1, 1, 1]} : vector<12x8x8xf32> to vector<4x8x8xf32>
    %58 = arith.truncf %57 : vector<4x8x8xf32> to vector<4x8x8xbf16>
    "tpu.trace_start"() <{level = 10 : i32, message = "htd,hsd->hts"}> : () -> ()
    %cst_21 = arith.constant dense<0.000000e+00> : vector<4x8x8xf32>
    %59 = tpu.matmul %54, %56, %cst_21 {dimension_numbers = #tpu.dot_dimension_numbers<[2], [2], [1], [1], [0, 0, 0, 1, 1, 1], [0], [0]>} : vector<4x8x8xbf16>, vector<4x8x8xbf16>, vector<4x8x8xf32> -> vector<4x8x8xf32>
    "tpu.trace_stop"() : () -> ()
    %cst_22 = arith.constant 0.353553385 : f32
    %60 = vector.broadcast %cst_22 : f32 to vector<4x8x8xf32>
    %61 = arith.mulf %59, %60 : vector<4x8x8xf32>
    %62 = vector.broadcast %24 : vector<1x8x8xf32> to vector<4x8x8xf32>
    %63 = arith.addf %61, %62 : vector<4x8x8xf32>
    %cst_23 = arith.constant dense<0xFF800000> : vector<4x8xf32>
    %64 = vector.multi_reduction <maximumf>, %63, %cst_23 [2] : vector<4x8x8xf32> to vector<4x8xf32>
    %65 = vector.shape_cast %64 : vector<4x8xf32> to vector<4x8x1xf32>
    %66 = vector.broadcast %65 : vector<4x8x1xf32> to vector<4x8x8xf32>
    %67 = arith.subf %63, %66 : vector<4x8x8xf32>
    %68 = math.exp %67 : vector<4x8x8xf32>
    %cst_24 = arith.constant dense<0.000000e+00> : vector<4x8xf32>
    %69 = vector.multi_reduction <add>, %68, %cst_24 [2] : vector<4x8x8xf32> to vector<4x8xf32>
    %70 = vector.shape_cast %69 : vector<4x8xf32> to vector<4x8x1xf32>
    %71 = tpu.reciprocal %70 {approx = true} : vector<4x8x1xf32> -> vector<4x8x1xf32>
    %72 = vector.broadcast %71 : vector<4x8x1xf32> to vector<4x8x8xf32>
    %73 = arith.mulf %68, %72 : vector<4x8x8xf32>
    %74 = arith.truncf %73 : vector<4x8x8xf32> to vector<4x8x8xbf16>
    "tpu.trace_start"() <{level = 10 : i32, message = "hts,hsd->htd"}> : () -> ()
    %cst_25 = arith.constant dense<0.000000e+00> : vector<4x8x8xf32>
    %75 = tpu.matmul %74, %58, %cst_25 {dimension_numbers = #tpu.dot_dimension_numbers<[2], [1], [1], [2], [0, 0, 0, 1, 1, 2], [0], [0]>} : vector<4x8x8xbf16>, vector<4x8x8xbf16>, vector<4x8x8xf32> -> vector<4x8x8xf32>
    "tpu.trace_stop"() : () -> ()
    %76 = tpu.transpose %75, [1, 0, 2] : vector<4x8x8xf32> -> vector<8x4x8xf32>
    %77 = vector.shape_cast %76 : vector<8x4x8xf32> to vector<8x32xf32>
    %78 = arith.truncf %77 : vector<8x32xf32> to vector<8x32xbf16>
    %c0_26 = arith.constant 0 : index
    %c0_27 = arith.constant 0 : index
    %c0_28 = arith.constant 0 : index
    %79 = vector.load %arg6[%c0_26, %c0_27, %c0_28] : memref<2x32x32xbf16, #tpu.memory_space<vmem>>, vector<1x32x32xbf16>
    %80 = vector.shape_cast %79 : vector<1x32x32xbf16> to vector<32x32xbf16>
    %cst_29 = arith.constant dense<0.000000e+00> : vector<8x32xf32>
    %81 = tpu.matmul %78, %80, %cst_29 {dimension_numbers = #tpu.dot_dimension_numbers<[1], [0], [0], [1], [0, 0, 1, 1], [], []>} : vector<8x32xbf16>, vector<32x32xbf16>, vector<8x32xf32> -> vector<8x32xf32>
    %82 = arith.addf %17, %81 : vector<8x32xf32>
    %c0_30 = arith.constant 0 : index
    %c0_31 = arith.constant 0 : index
    %c0_32 = arith.constant 0 : index
    %83 = vector.load %arg7[%c0_30, %c0_31, %c0_32] : memref<2x1x32xf32, #tpu.memory_space<vmem>>, vector<1x1x32xf32>
    %84 = vector.shape_cast %83 : vector<1x1x32xf32> to vector<1x32xf32>
    %85 = vector.broadcast %84 : vector<1x32xf32> to vector<8x32xf32>
    %86 = arith.addf %82, %85 : vector<8x32xf32>
    %cst_33 = arith.constant dense<0.000000e+00> : vector<8xf32>
    %87 = vector.multi_reduction <add>, %86, %cst_33 [1] : vector<8x32xf32> to vector<8xf32>
    %88 = vector.shape_cast %87 : vector<8xf32> to vector<8x1xf32>
    %cst_34 = arith.constant 3.200000e+01 : f32
    %89 = vector.broadcast %cst_34 : f32 to vector<8x1xf32>
    %90 = arith.divf %88, %89 : vector<8x1xf32>
    %91 = vector.broadcast %90 : vector<8x1xf32> to vector<8x32xf32>
    %92 = arith.subf %86, %91 : vector<8x32xf32>
    %93 = arith.mulf %92, %92 : vector<8x32xf32>
    %cst_35 = arith.constant dense<0.000000e+00> : vector<8xf32>
    %94 = vector.multi_reduction <add>, %93, %cst_35 [1] : vector<8x32xf32> to vector<8xf32>
    %95 = vector.shape_cast %94 : vector<8xf32> to vector<8x1xf32>
    %cst_36 = arith.constant 3.200000e+01 : f32
    %96 = vector.broadcast %cst_36 : f32 to vector<8x1xf32>
    %97 = arith.divf %95, %96 : vector<8x1xf32>
    %98 = vector.broadcast %90 : vector<8x1xf32> to vector<8x32xf32>
    %99 = arith.subf %86, %98 : vector<8x32xf32>
    %cst_37 = arith.constant 9.99999974E-6 : f32
    %100 = vector.broadcast %cst_37 : f32 to vector<8x1xf32>
    %101 = arith.addf %97, %100 : vector<8x1xf32>
    %102 = math.rsqrt %101 : vector<8x1xf32>
    %103 = vector.broadcast %102 : vector<8x1xf32> to vector<8x32xf32>
    %104 = arith.mulf %99, %103 : vector<8x32xf32>
    %105 = arith.truncf %104 : vector<8x32xf32> to vector<8x32xbf16>
    %c0_38 = arith.constant 0 : index
    %c0_39 = arith.constant 0 : index
    %c0_40 = arith.constant 0 : index
    %106 = vector.load %arg8[%c0_38, %c0_39, %c0_40] : memref<2x32x128xbf16, #tpu.memory_space<vmem>>, vector<1x32x128xbf16>
    %107 = vector.shape_cast %106 : vector<1x32x128xbf16> to vector<32x128xbf16>
    %cst_41 = arith.constant dense<0.000000e+00> : vector<8x128xf32>
    %108 = tpu.matmul %105, %107, %cst_41 {dimension_numbers = #tpu.dot_dimension_numbers<[1], [0], [0], [1], [0, 0, 1, 1], [], []>} : vector<8x32xbf16>, vector<32x128xbf16>, vector<8x128xf32> -> vector<8x128xf32>
    %c0_42 = arith.constant 0 : index
    %c0_43 = arith.constant 0 : index
    %c0_44 = arith.constant 0 : index
    %109 = vector.load %arg9[%c0_42, %c0_43, %c0_44] : memref<2x1x128xf32, #tpu.memory_space<vmem>>, vector<1x1x128xf32>
    %110 = vector.shape_cast %109 : vector<1x1x128xf32> to vector<1x128xf32>
    %111 = vector.broadcast %110 : vector<1x128xf32> to vector<8x128xf32>
    %112 = arith.addf %108, %111 : vector<8x128xf32>
    %cst_45 = arith.constant 5.000000e-01 : f32
    %113 = vector.broadcast %cst_45 : f32 to vector<8x128xf32>
    %114 = arith.mulf %113, %112 : vector<8x128xf32>
    %cst_46 = arith.constant 4.471500e-02 : f32
    %115 = vector.broadcast %cst_46 : f32 to vector<8x128xf32>
    %116 = arith.mulf %115, %112 : vector<8x128xf32>
    %117 = arith.mulf %116, %112 : vector<8x128xf32>
    %118 = arith.mulf %117, %112 : vector<8x128xf32>
    %119 = arith.addf %112, %118 : vector<8x128xf32>
    %cst_47 = arith.constant 0.797884583 : f32
    %120 = vector.broadcast %cst_47 : f32 to vector<8x128xf32>
    %121 = arith.mulf %120, %119 : vector<8x128xf32>
    %122 = math.tanh %121 : vector<8x128xf32>
    %cst_48 = arith.constant 1.000000e+00 : f32
    %123 = vector.broadcast %cst_48 : f32 to vector<8x128xf32>
    %124 = arith.addf %123, %122 : vector<8x128xf32>
    %125 = arith.mulf %114, %124 : vector<8x128xf32>
    %126 = arith.truncf %125 : vector<8x128xf32> to vector<8x128xbf16>
    %c0_49 = arith.constant 0 : index
    %c0_50 = arith.constant 0 : index
    %c0_51 = arith.constant 0 : index
    %127 = vector.load %arg10[%c0_49, %c0_50, %c0_51] : memref<2x128x32xbf16, #tpu.memory_space<vmem>>, vector<1x128x32xbf16>
    %128 = vector.shape_cast %127 : vector<1x128x32xbf16> to vector<128x32xbf16>
    %cst_52 = arith.constant dense<0.000000e+00> : vector<8x32xf32>
    %129 = tpu.matmul %126, %128, %cst_52 {dimension_numbers = #tpu.dot_dimension_numbers<[1], [0], [0], [1], [0, 0, 1, 1], [], []>} : vector<8x128xbf16>, vector<128x32xbf16>, vector<8x32xf32> -> vector<8x32xf32>
    %130 = arith.addf %86, %129 : vector<8x32xf32>
    %c0_53 = arith.constant 0 : index
    %c0_54 = arith.constant 0 : index
    %c0_55 = arith.constant 0 : index
    %131 = vector.load %arg11[%c0_53, %c0_54, %c0_55] : memref<2x1x32xf32, #tpu.memory_space<vmem>>, vector<1x1x32xf32>
    %132 = vector.shape_cast %131 : vector<1x1x32xf32> to vector<1x32xf32>
    %133 = vector.broadcast %132 : vector<1x32xf32> to vector<8x32xf32>
    %134 = arith.addf %130, %133 : vector<8x32xf32>
    %cst_56 = arith.constant dense<0.000000e+00> : vector<8xf32>
    %135 = vector.multi_reduction <add>, %134, %cst_56 [1] : vector<8x32xf32> to vector<8xf32>
    %136 = vector.shape_cast %135 : vector<8xf32> to vector<8x1xf32>
    %cst_57 = arith.constant 3.200000e+01 : f32
    %137 = vector.broadcast %cst_57 : f32 to vector<8x1xf32>
    %138 = arith.divf %136, %137 : vector<8x1xf32>
    %139 = vector.broadcast %138 : vector<8x1xf32> to vector<8x32xf32>
    %140 = arith.subf %134, %139 : vector<8x32xf32>
    %141 = arith.mulf %140, %140 : vector<8x32xf32>
    %cst_58 = arith.constant dense<0.000000e+00> : vector<8xf32>
    %142 = vector.multi_reduction <add>, %141, %cst_58 [1] : vector<8x32xf32> to vector<8xf32>
    %143 = vector.shape_cast %142 : vector<8xf32> to vector<8x1xf32>
    %cst_59 = arith.constant 3.200000e+01 : f32
    %144 = vector.broadcast %cst_59 : f32 to vector<8x1xf32>
    %145 = arith.divf %143, %144 : vector<8x1xf32>
    %146 = vector.broadcast %138 : vector<8x1xf32> to vector<8x32xf32>
    %147 = arith.subf %134, %146 : vector<8x32xf32>
    %cst_60 = arith.constant 9.99999974E-6 : f32
    %148 = vector.broadcast %cst_60 : f32 to vector<8x1xf32>
    %149 = arith.addf %145, %148 : vector<8x1xf32>
    %150 = math.rsqrt %149 : vector<8x1xf32>
    %151 = vector.broadcast %150 : vector<8x1xf32> to vector<8x32xf32>
    %152 = arith.mulf %147, %151 : vector<8x32xf32>
    %153 = arith.truncf %152 : vector<8x32xf32> to vector<8x32xbf16>
    %c1 = arith.constant 1 : index
    %c0_61 = arith.constant 0 : index
    %c0_62 = arith.constant 0 : index
    %154 = vector.load %arg4[%c1, %c0_61, %c0_62] : memref<2x32x96xbf16, #tpu.memory_space<vmem>>, vector<1x32x96xbf16>
    %155 = vector.shape_cast %154 : vector<1x32x96xbf16> to vector<32x96xbf16>
    %cst_63 = arith.constant dense<0.000000e+00> : vector<8x96xf32>
    %156 = tpu.matmul %153, %155, %cst_63 {dimension_numbers = #tpu.dot_dimension_numbers<[1], [0], [0], [1], [0, 0, 1, 1], [], []>} : vector<8x32xbf16>, vector<32x96xbf16>, vector<8x96xf32> -> vector<8x96xf32>
    %c1_64 = arith.constant 1 : index
    %c0_65 = arith.constant 0 : index
    %c0_66 = arith.constant 0 : index
    %157 = vector.load %arg5[%c1_64, %c0_65, %c0_66] : memref<2x1x96xf32, #tpu.memory_space<vmem>>, vector<1x1x96xf32>
    %158 = vector.shape_cast %157 : vector<1x1x96xf32> to vector<1x96xf32>
    %159 = vector.broadcast %158 : vector<1x96xf32> to vector<8x96xf32>
    %160 = arith.addf %156, %159 : vector<8x96xf32>
    %161 = vector.shape_cast %160 : vector<8x96xf32> to vector<8x12x8xf32>
    %162 = tpu.transpose %161, [1, 0, 2] : vector<8x12x8xf32> -> vector<12x8x8xf32>
    %163 = vector.extract_strided_slice %162 {offsets = [0, 0, 0], sizes = [4, 8, 8], strides = [1, 1, 1]} : vector<12x8x8xf32> to vector<4x8x8xf32>
    %164 = arith.truncf %163 : vector<4x8x8xf32> to vector<4x8x8xbf16>
    %165 = vector.extract_strided_slice %162 {offsets = [4, 0, 0], sizes = [4, 8, 8], strides = [1, 1, 1]} : vector<12x8x8xf32> to vector<4x8x8xf32>
    %166 = arith.truncf %165 : vector<4x8x8xf32> to vector<4x8x8xbf16>
    %167 = vector.extract_strided_slice %162 {offsets = [8, 0, 0], sizes = [4, 8, 8], strides = [1, 1, 1]} : vector<12x8x8xf32> to vector<4x8x8xf32>
    %168 = arith.truncf %167 : vector<4x8x8xf32> to vector<4x8x8xbf16>
    "tpu.trace_start"() <{level = 10 : i32, message = "htd,hsd->hts"}> : () -> ()
    %cst_67 = arith.constant dense<0.000000e+00> : vector<4x8x8xf32>
    %169 = tpu.matmul %164, %166, %cst_67 {dimension_numbers = #tpu.dot_dimension_numbers<[2], [2], [1], [1], [0, 0, 0, 1, 1, 1], [0], [0]>} : vector<4x8x8xbf16>, vector<4x8x8xbf16>, vector<4x8x8xf32> -> vector<4x8x8xf32>
    "tpu.trace_stop"() : () -> ()
    %cst_68 = arith.constant 0.353553385 : f32
    %170 = vector.broadcast %cst_68 : f32 to vector<4x8x8xf32>
    %171 = arith.mulf %169, %170 : vector<4x8x8xf32>
    %172 = vector.broadcast %24 : vector<1x8x8xf32> to vector<4x8x8xf32>
    %173 = arith.addf %171, %172 : vector<4x8x8xf32>
    %cst_69 = arith.constant dense<0xFF800000> : vector<4x8xf32>
    %174 = vector.multi_reduction <maximumf>, %173, %cst_69 [2] : vector<4x8x8xf32> to vector<4x8xf32>
    %175 = vector.shape_cast %174 : vector<4x8xf32> to vector<4x8x1xf32>
    %176 = vector.broadcast %175 : vector<4x8x1xf32> to vector<4x8x8xf32>
    %177 = arith.subf %173, %176 : vector<4x8x8xf32>
    %178 = math.exp %177 : vector<4x8x8xf32>
    %cst_70 = arith.constant dense<0.000000e+00> : vector<4x8xf32>
    %179 = vector.multi_reduction <add>, %178, %cst_70 [2] : vector<4x8x8xf32> to vector<4x8xf32>
    %180 = vector.shape_cast %179 : vector<4x8xf32> to vector<4x8x1xf32>
    %181 = tpu.reciprocal %180 {approx = true} : vector<4x8x1xf32> -> vector<4x8x1xf32>
    %182 = vector.broadcast %181 : vector<4x8x1xf32> to vector<4x8x8xf32>
    %183 = arith.mulf %178, %182 : vector<4x8x8xf32>
    %184 = arith.truncf %183 : vector<4x8x8xf32> to vector<4x8x8xbf16>
    "tpu.trace_start"() <{level = 10 : i32, message = "hts,hsd->htd"}> : () -> ()
    %cst_71 = arith.constant dense<0.000000e+00> : vector<4x8x8xf32>
    %185 = tpu.matmul %184, %168, %cst_71 {dimension_numbers = #tpu.dot_dimension_numbers<[2], [1], [1], [2], [0, 0, 0, 1, 1, 2], [0], [0]>} : vector<4x8x8xbf16>, vector<4x8x8xbf16>, vector<4x8x8xf32> -> vector<4x8x8xf32>
    "tpu.trace_stop"() : () -> ()
    %186 = tpu.transpose %185, [1, 0, 2] : vector<4x8x8xf32> -> vector<8x4x8xf32>
    %187 = vector.shape_cast %186 : vector<8x4x8xf32> to vector<8x32xf32>
    %188 = arith.truncf %187 : vector<8x32xf32> to vector<8x32xbf16>
    %c1_72 = arith.constant 1 : index
    %c0_73 = arith.constant 0 : index
    %c0_74 = arith.constant 0 : index
    %189 = vector.load %arg6[%c1_72, %c0_73, %c0_74] : memref<2x32x32xbf16, #tpu.memory_space<vmem>>, vector<1x32x32xbf16>
    %190 = vector.shape_cast %189 : vector<1x32x32xbf16> to vector<32x32xbf16>
    %cst_75 = arith.constant dense<0.000000e+00> : vector<8x32xf32>
    %191 = tpu.matmul %188, %190, %cst_75 {dimension_numbers = #tpu.dot_dimension_numbers<[1], [0], [0], [1], [0, 0, 1, 1], [], []>} : vector<8x32xbf16>, vector<32x32xbf16>, vector<8x32xf32> -> vector<8x32xf32>
    %192 = arith.addf %134, %191 : vector<8x32xf32>
    %c1_76 = arith.constant 1 : index
    %c0_77 = arith.constant 0 : index
    %c0_78 = arith.constant 0 : index
    %193 = vector.load %arg7[%c1_76, %c0_77, %c0_78] : memref<2x1x32xf32, #tpu.memory_space<vmem>>, vector<1x1x32xf32>
    %194 = vector.shape_cast %193 : vector<1x1x32xf32> to vector<1x32xf32>
    %195 = vector.broadcast %194 : vector<1x32xf32> to vector<8x32xf32>
    %196 = arith.addf %192, %195 : vector<8x32xf32>
    %cst_79 = arith.constant dense<0.000000e+00> : vector<8xf32>
    %197 = vector.multi_reduction <add>, %196, %cst_79 [1] : vector<8x32xf32> to vector<8xf32>
    %198 = vector.shape_cast %197 : vector<8xf32> to vector<8x1xf32>
    %cst_80 = arith.constant 3.200000e+01 : f32
    %199 = vector.broadcast %cst_80 : f32 to vector<8x1xf32>
    %200 = arith.divf %198, %199 : vector<8x1xf32>
    %201 = vector.broadcast %200 : vector<8x1xf32> to vector<8x32xf32>
    %202 = arith.subf %196, %201 : vector<8x32xf32>
    %203 = arith.mulf %202, %202 : vector<8x32xf32>
    %cst_81 = arith.constant dense<0.000000e+00> : vector<8xf32>
    %204 = vector.multi_reduction <add>, %203, %cst_81 [1] : vector<8x32xf32> to vector<8xf32>
    %205 = vector.shape_cast %204 : vector<8xf32> to vector<8x1xf32>
    %cst_82 = arith.constant 3.200000e+01 : f32
    %206 = vector.broadcast %cst_82 : f32 to vector<8x1xf32>
    %207 = arith.divf %205, %206 : vector<8x1xf32>
    %208 = vector.broadcast %200 : vector<8x1xf32> to vector<8x32xf32>
    %209 = arith.subf %196, %208 : vector<8x32xf32>
    %cst_83 = arith.constant 9.99999974E-6 : f32
    %210 = vector.broadcast %cst_83 : f32 to vector<8x1xf32>
    %211 = arith.addf %207, %210 : vector<8x1xf32>
    %212 = math.rsqrt %211 : vector<8x1xf32>
    %213 = vector.broadcast %212 : vector<8x1xf32> to vector<8x32xf32>
    %214 = arith.mulf %209, %213 : vector<8x32xf32>
    %215 = arith.truncf %214 : vector<8x32xf32> to vector<8x32xbf16>
    %c1_84 = arith.constant 1 : index
    %c0_85 = arith.constant 0 : index
    %c0_86 = arith.constant 0 : index
    %216 = vector.load %arg8[%c1_84, %c0_85, %c0_86] : memref<2x32x128xbf16, #tpu.memory_space<vmem>>, vector<1x32x128xbf16>
    %217 = vector.shape_cast %216 : vector<1x32x128xbf16> to vector<32x128xbf16>
    %cst_87 = arith.constant dense<0.000000e+00> : vector<8x128xf32>
    %218 = tpu.matmul %215, %217, %cst_87 {dimension_numbers = #tpu.dot_dimension_numbers<[1], [0], [0], [1], [0, 0, 1, 1], [], []>} : vector<8x32xbf16>, vector<32x128xbf16>, vector<8x128xf32> -> vector<8x128xf32>
    %c1_88 = arith.constant 1 : index
    %c0_89 = arith.constant 0 : index
    %c0_90 = arith.constant 0 : index
    %219 = vector.load %arg9[%c1_88, %c0_89, %c0_90] : memref<2x1x128xf32, #tpu.memory_space<vmem>>, vector<1x1x128xf32>
    %220 = vector.shape_cast %219 : vector<1x1x128xf32> to vector<1x128xf32>
    %221 = vector.broadcast %220 : vector<1x128xf32> to vector<8x128xf32>
    %222 = arith.addf %218, %221 : vector<8x128xf32>
    %cst_91 = arith.constant 5.000000e-01 : f32
    %223 = vector.broadcast %cst_91 : f32 to vector<8x128xf32>
    %224 = arith.mulf %223, %222 : vector<8x128xf32>
    %cst_92 = arith.constant 4.471500e-02 : f32
    %225 = vector.broadcast %cst_92 : f32 to vector<8x128xf32>
    %226 = arith.mulf %225, %222 : vector<8x128xf32>
    %227 = arith.mulf %226, %222 : vector<8x128xf32>
    %228 = arith.mulf %227, %222 : vector<8x128xf32>
    %229 = arith.addf %222, %228 : vector<8x128xf32>
    %cst_93 = arith.constant 0.797884583 : f32
    %230 = vector.broadcast %cst_93 : f32 to vector<8x128xf32>
    %231 = arith.mulf %230, %229 : vector<8x128xf32>
    %232 = math.tanh %231 : vector<8x128xf32>
    %cst_94 = arith.constant 1.000000e+00 : f32
    %233 = vector.broadcast %cst_94 : f32 to vector<8x128xf32>
    %234 = arith.addf %233, %232 : vector<8x128xf32>
    %235 = arith.mulf %224, %234 : vector<8x128xf32>
    %236 = arith.truncf %235 : vector<8x128xf32> to vector<8x128xbf16>
    %c1_95 = arith.constant 1 : index
    %c0_96 = arith.constant 0 : index
    %c0_97 = arith.constant 0 : index
    %237 = vector.load %arg10[%c1_95, %c0_96, %c0_97] : memref<2x128x32xbf16, #tpu.memory_space<vmem>>, vector<1x128x32xbf16>
    %238 = vector.shape_cast %237 : vector<1x128x32xbf16> to vector<128x32xbf16>
    %cst_98 = arith.constant dense<0.000000e+00> : vector<8x32xf32>
    %239 = tpu.matmul %236, %238, %cst_98 {dimension_numbers = #tpu.dot_dimension_numbers<[1], [0], [0], [1], [0, 0, 1, 1], [], []>} : vector<8x128xbf16>, vector<128x32xbf16>, vector<8x32xf32> -> vector<8x32xf32>
    %240 = arith.addf %196, %239 : vector<8x32xf32>
    %c1_99 = arith.constant 1 : index
    %c0_100 = arith.constant 0 : index
    %c0_101 = arith.constant 0 : index
    %241 = vector.load %arg11[%c1_99, %c0_100, %c0_101] : memref<2x1x32xf32, #tpu.memory_space<vmem>>, vector<1x1x32xf32>
    %242 = vector.shape_cast %241 : vector<1x1x32xf32> to vector<1x32xf32>
    %243 = vector.broadcast %242 : vector<1x32xf32> to vector<8x32xf32>
    %244 = arith.addf %240, %243 : vector<8x32xf32>
    %245 = vector.extract_strided_slice %244 {offsets = [0, 0], sizes = [1, 32], strides = [1, 1]} : vector<8x32xf32> to vector<1x32xf32>
    %cst_102 = arith.constant dense<0.000000e+00> : vector<1xf32>
    %246 = vector.multi_reduction <add>, %245, %cst_102 [1] : vector<1x32xf32> to vector<1xf32>
    %247 = vector.shape_cast %246 : vector<1xf32> to vector<1x1xf32>
    %cst_103 = arith.constant 3.200000e+01 : f32
    %248 = vector.broadcast %cst_103 : f32 to vector<1x1xf32>
    %249 = arith.divf %247, %248 : vector<1x1xf32>
    %250 = vector.broadcast %249 : vector<1x1xf32> to vector<1x32xf32>
    %251 = arith.subf %245, %250 : vector<1x32xf32>
    %252 = arith.mulf %251, %251 : vector<1x32xf32>
    %cst_104 = arith.constant dense<0.000000e+00> : vector<1xf32>
    %253 = vector.multi_reduction <add>, %252, %cst_104 [1] : vector<1x32xf32> to vector<1xf32>
    %254 = vector.shape_cast %253 : vector<1xf32> to vector<1x1xf32>
    %cst_105 = arith.constant 3.200000e+01 : f32
    %255 = vector.broadcast %cst_105 : f32 to vector<1x1xf32>
    %256 = arith.divf %254, %255 : vector<1x1xf32>
    %257 = vector.broadcast %249 : vector<1x1xf32> to vector<1x32xf32>
    %258 = arith.subf %245, %257 : vector<1x32xf32>
    %cst_106 = arith.constant 9.99999974E-6 : f32
    %259 = vector.broadcast %cst_106 : f32 to vector<1x1xf32>
    %260 = arith.addf %256, %259 : vector<1x1xf32>
    %261 = math.rsqrt %260 : vector<1x1xf32>
    %262 = vector.broadcast %261 : vector<1x1xf32> to vector<1x32xf32>
    %263 = arith.mulf %258, %262 : vector<1x32xf32>
    %c0_107 = arith.constant 0 : index
    %c0_108 = arith.constant 0 : index
    %264 = vector.load %arg12[%c0_107, %c0_108] : memref<32x2xf32, #tpu.memory_space<vmem>>, vector<32x2xf32>
    %cst_109 = arith.constant dense<0.000000e+00> : vector<1x2xf32>
    %265 = tpu.matmul %263, %264, %cst_109 {dimension_numbers = #tpu.dot_dimension_numbers<[1], [0], [0], [1], [0, 0, 1, 1], [], []>} : vector<1x32xf32>, vector<32x2xf32>, vector<1x2xf32> -> vector<1x2xf32>
    %c0_110 = arith.constant 0 : index
    %c0_111 = arith.constant 0 : index
    %266 = vector.load %arg13[%c0_110, %c0_111] : memref<1x2xf32, #tpu.memory_space<vmem>>, vector<1x2xf32>
    %267 = arith.addf %265, %266 : vector<1x2xf32>
    %268 = vector.shape_cast %267 : vector<1x2xf32> to vector<1x1x2xf32>
    %c0_112 = arith.constant 0 : index
    %c0_113 = arith.constant 0 : index
    %c0_114 = arith.constant 0 : index
    %269 = vector.load %arg14[%c0_112, %c0_113, %c0_114] : memref<1x1x2xf32, #tpu.memory_space<vmem>>, vector<1x1x2xf32>
    tpu.vector_store %arg14[%c0_112, %c0_113, %c0_114], %268 {strides = array<i32>} : memref<1x1x2xf32, #tpu.memory_space<vmem>>, vector<1x1x2xf32>,
    return
  }
  func.func @transform_0(%arg0: i32) -> (i32, i32, i32) {
    %c0_i32 = arith.constant 0 : i32
    %c0_i32_0 = arith.constant 0 : i32
    %c0_i32_1 = arith.constant 0 : i32
    return %arg0, %c0_i32, %c0_i32_0 : i32, i32, i32
  }
  func.func @transform_1(%arg0: i32) -> (i32, i32) {
    %c0_i32 = arith.constant 0 : i32
    %c0_i32_0 = arith.constant 0 : i32
    %c0_i32_1 = arith.constant 0 : i32
    return %c0_i32, %c0_i32_0 : i32, i32
  }
  func.func @transform_2(%arg0: i32) -> (i32, i32) {
    %c0_i32 = arith.constant 0 : i32
    %c0_i32_0 = arith.constant 0 : i32
    %c0_i32_1 = arith.constant 0 : i32
    return %c0_i32, %c0_i32_0 : i32, i32
  }
  func.func @transform_3(%arg0: i32) -> (i32, i32, i32) {
    %c0_i32 = arith.constant 0 : i32
    %c0_i32_0 = arith.constant 0 : i32
    %c0_i32_1 = arith.constant 0 : i32
    %c0_i32_2 = arith.constant 0 : i32
    return %c0_i32, %c0_i32_0, %c0_i32_1 : i32, i32, i32
  }
  func.func @transform_4(%arg0: i32) -> (i32, i32, i32) {
    %c0_i32 = arith.constant 0 : i32
    %c0_i32_0 = arith.constant 0 : i32
    %c0_i32_1 = arith.constant 0 : i32
    %c0_i32_2 = arith.constant 0 : i32
    return %c0_i32, %c0_i32_0, %c0_i32_1 : i32, i32, i32
  }
  func.func @transform_5(%arg0: i32) -> (i32, i32, i32) {
    %c0_i32 = arith.constant 0 : i32
    %c0_i32_0 = arith.constant 0 : i32
    %c0_i32_1 = arith.constant 0 : i32
    %c0_i32_2 = arith.constant 0 : i32
    return %c0_i32, %c0_i32_0, %c0_i32_1 : i32, i32, i32
  }
  func.func @transform_6(%arg0: i32) -> (i32, i32, i32) {
    %c0_i32 = arith.constant 0 : i32
    %c0_i32_0 = arith.constant 0 : i32
    %c0_i32_1 = arith.constant 0 : i32
    %c0_i32_2 = arith.constant 0 : i32
    return %c0_i32, %c0_i32_0, %c0_i32_1 : i32, i32, i32
  }
  func.func @transform_7(%arg0: i32) -> (i32, i32, i32) {
    %c0_i32 = arith.constant 0 : i32
    %c0_i32_0 = arith.constant 0 : i32
    %c0_i32_1 = arith.constant 0 : i32
    %c0_i32_2 = arith.constant 0 : i32
    return %c0_i32, %c0_i32_0, %c0_i32_1 : i32, i32, i32
  }
  func.func @transform_8(%arg0: i32) -> (i32, i32, i32) {
    %c0_i32 = arith.constant 0 : i32
    %c0_i32_0 = arith.constant 0 : i32
    %c0_i32_1 = arith.constant 0 : i32
    %c0_i32_2 = arith.constant 0 : i32
    return %c0_i32, %c0_i32_0, %c0_i32_1 : i32, i32, i32
  }
  func.func @transform_9(%arg0: i32) -> (i32, i32, i32) {
    %c0_i32 = arith.constant 0 : i32
    %c0_i32_0 = arith.constant 0 : i32
    %c0_i32_1 = arith.constant 0 : i32
    %c0_i32_2 = arith.constant 0 : i32
    return %c0_i32, %c0_i32_0, %c0_i32_1 : i32, i32, i32
  }
  func.func @transform_10(%arg0: i32) -> (i32, i32, i32) {
    %c0_i32 = arith.constant 0 : i32
    %c0_i32_0 = arith.constant 0 : i32
    %c0_i32_1 = arith.constant 0 : i32
    %c0_i32_2 = arith.constant 0 : i32
    return %c0_i32, %c0_i32_0, %c0_i32_1 : i32, i32, i32
  }
  func.func @transform_11(%arg0: i32) -> (i32, i32) {
    %c0_i32 = arith.constant 0 : i32
    %c0_i32_0 = arith.constant 0 : i32
    %c0_i32_1 = arith.constant 0 : i32
    return %c0_i32, %c0_i32_0 : i32, i32
  }
  func.func @transform_12(%arg0: i32) -> (i32, i32) {
    %c0_i32 = arith.constant 0 : i32
    %c0_i32_0 = arith.constant 0 : i32
    %c0_i32_1 = arith.constant 0 : i32
    return %c0_i32, %c0_i32_0 : i32, i32
  }
  func.func @transform_13(%arg0: i32) -> (i32, i32, i32) {
    %c0_i32 = arith.constant 0 : i32
    %c0_i32_0 = arith.constant 0 : i32
    %c0_i32_1 = arith.constant 0 : i32
    return %arg0, %c0_i32, %c0_i32_0 : i32, i32, i32
  }
}

</mosaic_0001>

<bundles_post_ra>
// kernel: forward.1
= control target key start
LH: loop header
LB: loop body
LE: loop exit
PB: predicated region body
PF: predicated region fallthrough
CT: control target
= control target key end

     0   :  { %s2954_s25 = smov 0   ;;  %s3682_s0 = inlined_call_operand.vmem [shape: s32[2,8,1], index: 0, kind: input, shape index: {}]   ;;  %s3683_s1 = inlined_call_operand.vmem [shape: f32[100,32], index: 1, kind: input, shape index: {}]   ;;  %s3684_s2 = inlined_call_operand.vmem [shape: f32[16,32], index: 2, kind: input, shape index: {}]   ;;  %s3685_s3 = inlined_call_operand.vmem [shape: bf16[2,32,96], index: 3, kind: input, shape index: {}]   ;;  %s3686_s4 = inlined_call_operand.vmem [shape: f32[2,1,96], index: 4, kind: input, shape index: {}]   ;;  %s3687_s5 = inlined_call_operand.vmem [shape: bf16[2,32,32], index: 5, kind: input, shape index: {}]   ;;  %s3688_s6 = inlined_call_operand.vmem [shape: f32[2,1,32], index: 6, kind: input, shape index: {}]   ;;  %s3689_s7 = inlined_call_operand.vmem [shape: bf16[2,32,128], index: 7, kind: input, shape index: {}]   ;;  %s3690_s8 = inlined_call_operand.vmem [shape: f32[2,1,128], index: 8, kind: input, shape index: {}]   ;;  %s3691_s9 = inlined_call_operand.vmem [shape: bf16[2,128,32], index: 9, kind: input, shape index: {}]   ;;  %s3692_s10 = inlined_call_operand.vmem [shape: f32[2,1,32], index: 10, kind: input, shape index: {}]   ;;  %s3693_s11 = inlined_call_operand.vmem [shape: f32[32,2], index: 11, kind: input, shape index: {}]   ;;  %s3694_s12 = inlined_call_operand.vmem [shape: f32[1,2], index: 12, kind: input, shape index: {}]   ;;  %s3695_s13 = inlined_call_operand.vmem [shape: f32[2,1,2], index: 13, kind: output, shape index: {}]  }
   0x1 LB: > { %s2563_s26 = sadd.s32 4294967295, %s2862_s25   ;;  %p2567_p0 = scmp.ge.s32.totalorder %s2862_s25, 1  ;;  %s2862_s25 = sphi %s2954_s25, %s23_s25  }
   0x2   : > { %p386_p1 = scmp.lt.s32.totalorder %s2862_s25, 3 }
   0x4   : > { %p387_p2 = pnand %p2567_p0, %p386_p1 }
   0x5   : > { %p427_p3 = scmp.lt.s32.totalorder (!%p387_p2), %s2563_s26, 1  ;;  %s3702_s20 = smov (!%p387_p2), 64  }
   0x6   : > { %390 = sbr.rel (%p387_p2) target bundleno = 4494 (0x118e), region = 72  ;;  %s2868_s21 = smov (!%p387_p2), 120  }
   0x7   : > { %s2869_s22 = smov (!%p387_p2), 88   ;;  %s3704_s23 = smov (!%p387_p2), 96  }
   0x8   : > { %s2871_s24 = smov (!%p387_p2), 112   ;;  %s2873_s28 = smov (!%p387_p2), 104  }
   0x9   : > { %s2874_s29 = smov (!%p387_p2), 80   ;;  %s3698_s30 = smov (!%p387_p2), 40  }
   0xa   : > { %s3697_s14 = smov (!%p387_p2), 56   ;;  %s3696_s15 = smov (!%p387_p2), 48  }
   0xb   : > { %v456_v0 = vld [vmem:[%s3683_s1 + $0x60] sm:$0xf]  ;;  %vm492_vm0 = vcmask 1043456   ;;  %v455_v1 = vld [vmem:[%s3683_s1 + $0x58] sm:$0xff]  ;;  %v2864_v2 = vmov 0   ;;  %s3715_s26 = smov (!%p427_p3, %s2563_s26), 1  ;;  %v436_v15 = vlaneseq }
   0xc   : > { %2799 = vset.pattern.permute.xlu0 %v2864_v2  ;;  %2572 = vmatpush.msk.msra.mxu1 %vm492_vm0, %v456_v0  ;;  %v454_v3 = vld [vmem:[%s3683_s1 + $0x50] sm:$0xff]  ;;  %v453_v4 = vld [vmem:[%s3683_s1 + $0x48] sm:$0xff]  ;;  %s2568_s18 = sshll.u32 %s3715_s26, 3  ;;  %v452_v5 = vld [vmem:[%s3683_s1 + $0x40] sm:$0xff]  ;;  %v2865_v20 = vmov 0.0   ;;  %vm464_vm2 = vcmask 130048  }
   0xd   : > { %v463_v6 = vld [vmem:[%s3684_s2 + $0x8] sm:$0xff]  ;;  %s430_s27 = scalar_lea.vmem %s3682_s0, %s2568_s18  ;;  %v451_v8 = vld [vmem:[%s3683_s1 + $0x38] sm:$0xff]  ;;  %v450_v9 = vld [vmem:[%s3683_s1 + $0x30] sm:$0xff]  ;;  %v3008_v16 = vand.u32 127, %v436_v15  ;;  %v3010_v17 = vshrl.u32 %v436_v15, 7  ;;  %vm488_vm4 = vcmask 818176  }
   0xe   : > { %500 = vmatpush.msra.mxu1 %v455_v1  ;;  %482 = vmatpush.msra.mxu0 %v463_v6  ;;  %v435_v7 = vld [vmem:[%s430_s27] sm:$0xff]  ;;  %v449_v10 = vld [vmem:[%s3683_s1 + $0x28] sm:$0xff]  ;;  %v447_v12 = vld [vmem:[%s3683_s1 + $0x18] sm:$0xff]  ;;  %vm518_vm6 = vcmask 261120   ;;  %v2866_v28 = vmov 32.0   ;;  %s3703_s27 = smov 72  }
   0xf   : > { %439 = vperm.xlu0 %2799, %v435_v7   ;;  %v448_v11 = vld [vmem:[%s3683_s1 + $0x20] sm:$0xff]  ;;  %v446_v13 = vld [vmem:[%s3683_s1 + $0x10] sm:$0xff]  ;;  %v445_v14 = vld [vmem:[%s3683_s1 + $0x8] sm:$0xff]  ;;  %vm459_vm1 = vcmp.eq.s32.totalorder %v3010_v17, %v3008_v16  ;;  %vm516_vm3 = vcmp.le.s32.totalorder %v3008_v16, %v3010_v17  ;;  %2808 = vrcp.f32 %v2866_v28  ;;  %v2875_v61 = vmov 1983009808   ;;  %s3700_s16 = smov 24  }
  0x10   : > { %501 = vmatpush.msra.mxu1 %v454_v3  ;;  %v462_v18 = vld [vmem:[%s3684_s2] sm:$0xff]  ;;  %v2570_v21 = vsel %vm459_vm1, 1.0, %v2865_v20  ;;  %v2744_v40 = vld [vmem:[%s3685_s3 + $0x8] sm:$0xff]  ;;  %v625_v62 = vunpack.c.l.s4 %v2875_v61  ;;  %vm620_vm11 = vcmask 1047556   ;;  %vm966_vm12 = vcmask 64512   ;;  %s3701_s17 = smov 16  }
  0x11   : > { %v444_v19 = vld [vmem:[%s3683_s1] sm:$0xff]  ;;  %483 = vmatpush.msra.mxu0 %v462_v18  ;;  %578 = vmatpush.bf16.msra.mxu2 %v2744_v40  ;;  %s3699_s18 = smov 8   ;;  %vm1299_vm13 = vcmask 195584  }
  0x12   : > { %502 = vmatpush.msra.mxu1 %v453_v4  ;;  %2571 = vmatmul.msk.f32.vlgmr.msra.gmra.mxu0 %vm464_vm2, %v2570_v21  ;;  %v2743_v41 = vld [vmem:[%s3685_s3] sm:$0xff]  ;;  %v3062_v1 = vunpack.c.0.s8 %v625_v62 }
  0x13   : > { %v2800_v54 = vld [vmem:[%s3686_s4] ss:$0 sm:$0xff] }
  0x14   : > { %503 = vmatpush.msra.mxu1 %v452_v5 }
  0x15   : > { %v2809_v29 = vpop.eup %2808  ;;  %579 = vmatpush.bf16.msra.mxu2 %v2743_v41 }
  0x16   : > { %504 = vmatpush.msra.mxu1 %v451_v8  ;;  %v523_v30 = vmul.f32 32.0, %v2809_v29  ;;  %vm527_vm7 = vweird.f32 %v2809_v29 }
  0x18   : > { %505 = vmatpush.msra.mxu1 %v450_v9  ;;  %v524_v31 = vsub.f32 1.0, %v523_v30 }
  0x1a   : > { %506 = vmatpush.msra.mxu1 %v449_v10  ;;  %v525_v32 = vmul.f32 %v2809_v29, %v524_v31 }
  0x1c   : > { %507 = vmatpush.msra.mxu1 %v448_v11  ;;  %v526_v33 = vadd.f32 %v2809_v29, %v525_v32  ;;  %v2876_v11 = vmov 1934713408  }
  0x1e   : > { %508 = vmatpush.msra.mxu1 %v447_v12  ;;  %v3028_v34 = vsel %vm527_vm7, %v2809_v29, %v526_v33  ;;  %v673_v12 = vunpack.c.l.s4 %v2876_v11 }
  0x20   : > { %509 = vmatpush.msra.mxu1 %v446_v13 }
  0x22   : > { %510 = vmatpush.msra.mxu1 %v445_v14 }
  0x24   : > { %511 = vmatpush.msra.mxu1 %v444_v19 }
  0x81   : > { %v440_v22 = vpop.permute.xlu0 %439 }
  0x82   : > { %vm441_vm5 = vcmp.eq.s32.totalorder %v440_v22, %v3008_v16  ;;  %v3073_v22 = vunpack.c.0.s8 %v673_v12 }
  0x83   : > { %v2569_v23 = vsel %vm441_vm5, 1.0, %v2865_v20 }
  0x84   : > { %2573 = vmatmul.msk.f32.vlgmr.msra.gmra.mxu1 %vm488_vm4, %v2569_v23 }
  0x8f   : > { %v485_v24 = vpop.f32.mrf.mxu0 }
 0x101   : > { %v513_v25 = vpop.f32.mrf.mxu1 }
 0x102   : > { %v3024_v26 = vadd.f32 %v513_v25, %v485_v24 }
 0x104   : > { %v519_v27 = vsel %vm518_vm6, %v3024_v26, 0.0 }
 0x105   : > { %520 = vadd.xlane.f32.xlu0 %v519_v27 }
 0x178   : > { %v521_v35 = vpop.xlane.xlu0 %520 }
 0x179   : > { %v529_v36 = vmul.f32 %v3028_v34, %v521_v35 }
 0x17b   : > { %v530_v37 = vsub.f32 %v3024_v26, %v529_v36 }
 0x17d   : > { %v531_v38 = vmul.f32 %v530_v37, %v530_v37 }
 0x17f   : > { %v532_v39 = vsel %vm518_vm6, %v531_v38, 0.0 }
 0x180   : > { %533 = vadd.xlane.f32.xlu1 %v532_v39 }
 0x1f3   : > { %v534_v42 = vpop.xlane.xlu1 %533 }
 0x1f4   : > { %v535_v43 = vmul.f32 %v534_v42, %v3028_v34 }
 0x1f6   : > { %v536_v44 = vadd.f32 1e-05, %v535_v43 }
 0x1f8   : > { %2810 = vrsqrt.f32 %v536_v44  ;;  %vm543_vm9 = vweird.f32 %v536_v44 }
 0x1fe   : > { %v2811_v45 = vpop.eup %2810 }
 0x1ff   : > { %v538_v46 = vmul.f32 %v2811_v45, %v536_v44  ;;  %vm544_vm8 = vweird.f32 %v2811_v45 }
 0x200   : > { %vm545_vm10 = vmor %vm543_vm9, %vm544_vm8  ;;  %vm2463_vm8 = vcmask 253952  }
 0x201   : > { %v539_v47 = vmul.f32 %v2811_v45, %v538_v46 }
 0x203   : > { %v540_v48 = vmul.f32 0.5, %v539_v47 }
 0x205   : > { %v541_v49 = vsub.f32 1.5, %v540_v48 }
 0x207   : > { %v542_v50 = vmul.f32 %v2811_v45, %v541_v49 }
 0x209   : > { %v546_v51 = vsel %vm545_vm10, %v2811_v45, %v542_v50 }
 0x20a   : > { %v547_v52 = vmul.f32 %v546_v51, %v530_v37 }
 0x20c   : > { %v548_v53 = vpack.c.bf16 %v547_v52, %v547_v52 }
 0x20e   : > { %2582 = vmatmul.msk.bf16.vlgmr.msra.gmra.mxu2 %vm518_vm6, %v548_v53 }
 0x291   : > { %v581_v55 = vpop.f32.mrf.mxu2 }
 0x292   : > { %v3044_v56 = vadd.f32 %v2800_v54, %v581_v55 }
 0x294   : > { %607 = vrot.lane.b32.xlu0 %v3044_v56, %s3702_s20  ;;  %586 = vrot.lane.b32.xlu2 %v3044_v56, %s2868_s21  ;;  %v622_v20 = vrot.slane %v3044_v56, 4 }
 0x295   : > { %598 = vrot.lane.b32.xlu1 %v3044_v56, %s2869_s22 }
 0x299   : > { %v583_v57 = vpop.f32.mrf.mxu2 }
 0x29c   : > { %595 = vrot.lane.b32.xlu2 %v3044_v56, %s3704_s23  ;;  %s3712_s23 = smov 24  }
 0x29d   : > { %589 = vrot.lane.b32.xlu1 %v3044_v56, %s2871_s24 }
 0x2a4   : > { %604 = vrot.lane.b32.xlu2 %v3044_v56, %s3703_s27  ;;  %s3713_s27 = smov 8  }
 0x2ac   : > { %592 = vrot.lane.b32.xlu2 %v3044_v56, %s2873_s28 }
 0x2b4   : > { %601 = vrot.lane.b32.xlu2 %v3044_v56, %s2874_s29 }
 0x2ee   : > { %v587_v58 = vpop.permute.xlu2 %586 }
 0x2ef   : > { %v634_v63 = vrot.slane %v587_v58, 4 }
 0x2f6   : > { %v596_v59 = vpop.permute.xlu2 %595 }
 0x2f7   : > { %v646_v14 = vrot.slane %v596_v59, 4 }
 0x2fe   : > { %v605_v60 = vpop.permute.xlu2 %604 }
 0x2ff   : > { %v656_v4 = vrot.slane %v605_v60, 4 }
 0x306   : > { %v593_v0 = vpop.permute.xlu2 %592 }
 0x307   : > { %v632_v2 = vrot.slane %v593_v0, 4  ;;  %v599_v3 = vpop.permute.xlu1 %598  ;;  %v635_v5 = vsel %vm620_vm11, %v593_v0, %v634_v63 }
 0x308   : > { %v658_v6 = vrot.slane %v599_v3, 4  ;;  %v657_v8 = vsel %vm620_vm11, %v656_v4, %v599_v3  ;;  %v643_v10 = vperm.slane %v635_v5, %v3062_v1 }
 0x309   : > { %v633_v7 = vsel %vm620_vm11, %v632_v2, %v587_v58  ;;  %v663_v18 = vperm.slane %v657_v8, %v3062_v1 }
 0x30a   : > { %v659_v9 = vsel %vm620_vm11, %v605_v60, %v658_v6  ;;  %v639_v15 = vperm.slane %v633_v7, %v3062_v1  ;;  %v680_v21 = vrot.slane %v643_v10, 4 }
 0x30b   : > { %v667_v13 = vperm.slane %v659_v9, %v3062_v1  ;;  %v692_v32 = vrot.slane %v663_v18, 4 }
 0x30c   : > { %v668_v31 = vrot.slane %v639_v15, 4 }
 0x30d   : > { %v704_v27 = vrot.slane %v667_v13, 4 }
 0x30e   : > { %v602_v19 = vpop.permute.xlu2 %601 }
 0x30f   : > { %v644_v23 = vrot.slane %v602_v19, 4  ;;  %v647_v24 = vsel %vm620_vm11, %v602_v19, %v646_v14  ;;  %v590_v25 = vpop.permute.xlu1 %589 }
 0x310   : > { %v655_v28 = vperm.slane %v647_v24, %v3062_v1  ;;  %v619_v29 = vrot.slane %v590_v25, 4  ;;  %v623_v30 = vsel %vm620_vm11, %v590_v25, %v622_v20 }
 0x311   : > { %v645_v33 = vsel %vm620_vm11, %v644_v23, %v596_v59  ;;  %v631_v35 = vperm.slane %v623_v30, %v3062_v1 }
 0x312   : > { %v651_v36 = vperm.slane %v645_v33, %v3062_v1  ;;  %v705_v37 = vsel %vm620_vm11, %v704_v27, %v655_v28  ;;  %v706_v38 = vrot.slane %v655_v28, 4  ;;  %v621_v39 = vsel %vm620_vm11, %v619_v29, %v3044_v56 }
 0x313   : > { %v711_v40 = vperm.slane %v705_v37, %v3073_v22  ;;  %v627_v41 = vperm.slane %v621_v39, %v3062_v1  ;;  %v681_v42 = vsel %vm620_vm11, %v680_v21, %v631_v35  ;;  %v682_v43 = vrot.slane %v631_v35, 4 }
 0x314   : > { %v693_v44 = vsel %vm620_vm11, %v692_v32, %v651_v36  ;;  %v694_v45 = vrot.slane %v651_v36, 4  ;;  %v707_v46 = vsel %vm620_vm11, %v667_v13, %v706_v38  ;;  %v687_v47 = vperm.slane %v681_v42, %v3073_v22 }
 0x315   : > { %v699_v48 = vperm.slane %v693_v44, %v3073_v22  ;;  %v715_v49 = vperm.slane %v707_v46, %v3073_v22  ;;  %v724_v50 = vrot.slane %v711_v40, 4  ;;  %v669_v51 = vsel %vm620_vm11, %v668_v31, %v627_v41 }
 0x316   : > { %v695_v52 = vsel %vm620_vm11, %v663_v18, %v694_v45  ;;  %v670_v53 = vrot.slane %v627_v41, 4  ;;  %v675_v54 = vperm.slane %v669_v51, %v3073_v22  ;;  %v683_v55 = vsel %vm620_vm11, %v643_v10, %v682_v43 }
 0x317   : > { %v703_v57 = vperm.slane %v695_v52, %v3073_v22  ;;  %v716_v58 = vrot.slane %v699_v48, 4  ;;  %v728_v59 = vrot.slane %v715_v49, 4  ;;  %v691_v60 = vperm.slane %v683_v55, %v3073_v22 }
 0x318   : > { %v671_v61 = vsel %vm620_vm11, %v639_v15, %v670_v53  ;;  %v718_v62 = vrot.slane %v675_v54, 4  ;;  %v725_v63 = vsel %vm620_vm11, %v724_v50, %v687_v47  ;;  %v726_v0 = vrot.slane %v687_v47, 4 }
 0x319   : > { %v720_v2 = vrot.slane %v703_v57, 4  ;;  %v679_v3 = vperm.slane %v671_v61, %v3073_v22  ;;  %v717_v4 = vsel %vm620_vm11, %v716_v58, %v675_v54  ;;  %v729_v5 = vsel %vm620_vm11, %v728_v59, %v691_v60 }
 0x31a   : > { %v719_v6 = vsel %vm620_vm11, %v699_v48, %v718_v62  ;;  %v727_v7 = vsel %vm620_vm11, %v711_v40, %v726_v0  ;;  %v730_v8 = vrot.slane %v691_v60, 4  ;;  %v812_v9 = vrot.slane %v729_v5, 4 }
 0x31b   : > { %v722_v10 = vrot.slane %v679_v3, 4  ;;  %v814_v11 = vrot.slane %v725_v63, 4  ;;  %v826_v12 = vrot.slane %v727_v7, 4  ;;  %v721_v13 = vsel %vm620_vm11, %v720_v2, %v679_v3 }
 0x31c   : > { %v731_v14 = vsel %vm620_vm11, %v715_v49, %v730_v8  ;;  %v813_v15 = vsel %vm620_vm11, %v812_v9, %v725_v63  ;;  %v788_v18 = vrot.slane %v721_v13, 4  ;;  %v790_v19 = vrot.slane %v717_v4, 4 }
 0x31d   : > { %v819_v20 = vperm.slane %v813_v15, %v3062_v1  ;;  %v824_v21 = vrot.slane %v731_v14, 4  ;;  %v723_v23 = vsel %vm620_vm11, %v703_v57, %v722_v10  ;;  %v802_v24 = vrot.slane %v719_v6, 4 }
 0x31e   : > { %v791_v25 = vsel %vm620_vm11, %v721_v13, %v790_v19  ;;  %v800_v27 = vrot.slane %v723_v23, 4  ;;  %v815_v28 = vsel %vm620_vm11, %v729_v5, %v814_v11  ;;  %v827_v29 = vsel %vm620_vm11, %v731_v14, %v826_v12 }
 0x31f   : > { %v825_v30 = vsel %vm620_vm11, %v824_v21, %v727_v7  ;;  %v862_v31 = vrot.slane %v819_v20, 4  ;;  %v799_v32 = vperm.slane %v791_v25, %v3062_v1  ;;  %v803_v33 = vsel %vm620_vm11, %v723_v23, %v802_v24 }
 0x320   : > { %v831_v35 = vperm.slane %v825_v30, %v3062_v1  ;;  %v811_v36 = vperm.slane %v803_v33, %v3062_v1  ;;  %v823_v37 = vperm.slane %v815_v28, %v3062_v1  ;;  %v835_v38 = vperm.slane %v827_v29, %v3062_v1 }
 0x321   : > { %v850_v39 = vrot.slane %v799_v32, 4  ;;  %v789_v40 = vsel %vm620_vm11, %v788_v18, %v717_v4  ;;  %v801_v41 = vsel %vm620_vm11, %v800_v27, %v719_v6 }
 0x322   : > { %v848_v42 = vrot.slane %v811_v36, 4  ;;  %v872_v43 = vrot.slane %v835_v38, 4  ;;  %v874_v44 = vrot.slane %v823_v37, 4  ;;  %v795_v45 = vperm.slane %v789_v40, %v3062_v1 }
 0x323   : > { %v851_v46 = vsel %vm620_vm11, %v811_v36, %v850_v39  ;;  %v807_v47 = vperm.slane %v801_v41, %v3062_v1  ;;  %v860_v48 = vrot.slane %v831_v35, 4  ;;  %v863_v49 = vsel %vm620_vm11, %v831_v35, %v862_v31 }
 0x324   : > { %v849_v50 = vsel %vm620_vm11, %v848_v42, %v799_v32  ;;  %v873_v51 = vsel %vm620_vm11, %v872_v43, %v823_v37  ;;  %v859_v52 = vperm.slane %v851_v46, %v3073_v22  ;;  %v875_v53 = vsel %vm620_vm11, %v835_v38, %v874_v44 }
 0x325   : > { %v855_v54 = vperm.slane %v849_v50, %v3073_v22  ;;  %v879_v55 = vperm.slane %v873_v51, %v3073_v22  ;;  %v883_v57 = vperm.slane %v875_v53, %v3073_v22  ;;  %v836_v58 = vrot.slane %v807_v47, 4 }
 0x326   : > { %v898_v59 = vrot.slane %v859_v52, 4  ;;  %v861_v60 = vsel %vm620_vm11, %v860_v48, %v819_v20  ;;  %v838_v61 = vrot.slane %v795_v45, 4  ;;  %v871_v62 = vperm.slane %v863_v49, %v3073_v22 }
 0x327   : > { %v892_v63 = vrot.slane %v879_v55, 4  ;;  %v896_v0 = vrot.slane %v883_v57, 4  ;;  %v894_v2 = vrot.slane %v855_v54, 4  ;;  %v837_v3 = vsel %vm620_vm11, %v836_v58, %v795_v45  ;;  %v608_v58 = vpop.permute.xlu0 %607 }
 0x328   : > { %v899_v4 = vsel %vm620_vm11, %v883_v57, %v898_v59  ;;  %v843_v5 = vperm.slane %v837_v3, %v3073_v22  ;;  %v867_v6 = vperm.slane %v861_v60, %v3073_v22  ;;  %v839_v7 = vsel %vm620_vm11, %v807_v47, %v838_v61 }
 0x329   : > { %v893_v8 = vsel %vm620_vm11, %v892_v63, %v855_v54  ;;  %v897_v9 = vsel %vm620_vm11, %v896_v0, %v859_v52  ;;  %v895_v10 = vsel %vm620_vm11, %v879_v55, %v894_v2  ;;  %v961_v11 = vpack.c.bf16 %v899_v4, %v899_v4 }
 0x32a   : > { %v958_v12 = vpack.c.bf16 %v893_v8, %v893_v8  ;;  %v960_v13 = vpack.c.bf16 %v897_v9, %v897_v9  ;;  %v959_v14 = vpack.c.bf16 %v895_v10, %v895_v10  ;;  %v884_v18 = vrot.slane %v867_v6, 4 }
 0x32b   : > { %v1028_v15 = vsel %vm966_vm12, %v961_v11, 0  ;;  %v847_v19 = vperm.slane %v839_v7, %v3073_v22  ;;  %v888_v20 = vrot.slane %v871_v62, 4  ;;  %v886_v25 = vrot.slane %v843_v5, 4 }
 0x32c   : > { %v971_v21 = vsel %vm966_vm12, %v958_v12, 0  ;;  %v1009_v23 = vsel %vm966_vm12, %v960_v13, 0  ;;  %v990_v24 = vsel %vm966_vm12, %v959_v14, 0  ;;  %1037 = vmatpush.bf16.xpose.msra.mxu3 %v1028_v15  ;;  %v885_v28 = vsel %vm620_vm11, %v884_v18, %v843_v5 }
 0x32d   : > { %980 = vmatpush.bf16.xpose.msrb.mxu1 %v971_v21  ;;  %1018 = vmatpush.bf16.xpose.msrb.mxu2 %v1009_v23  ;;  %v890_v27 = vrot.slane %v847_v19, 4  ;;  %v889_v29 = vsel %vm620_vm11, %v888_v20, %v847_v19  ;;  %v887_v31 = vsel %vm620_vm11, %v867_v6, %v886_v25  ;;  %v954_v33 = vpack.c.bf16 %v885_v28, %v885_v28 }
 0x32e   : > { %999 = vmatpush.bf16.xpose.msrb.mxu0 %v990_v24  ;;  %v956_v35 = vpack.c.bf16 %v889_v29, %v889_v29  ;;  %v955_v36 = vpack.c.bf16 %v887_v31, %v887_v31  ;;  %v2877_v37 = vmov -1e+09   ;;  %v734_v20 = vrot.slane %v608_v58, 4 }
 0x32f   : > { %v891_v30 = vsel %vm620_vm11, %v871_v62, %v890_v27  ;;  %v3159_v38 = vsel %vm516_vm3, 0.0, %v2877_v37 }
 0x330   : > { %v957_v32 = vpack.c.bf16 %v891_v30, %v891_v30 }
 0x333   : > { %2586 = vmatmul.msk.bf16.vlgmr.msra.gmra.mxu3 %vm966_vm12, %v957_v32 }
 0x334   : > { %2583 = vmatmul.msk.bf16.vlgmr.msrb.gmra.mxu1 %vm966_vm12, %v954_v33  ;;  %2585 = vmatmul.msk.bf16.vlgmr.msrb.gmra.mxu2 %vm966_vm12, %v956_v35 }
 0x335   : > { %2584 = vmatmul.msk.bf16.vlgmr.msrb.gmra.mxu0 %vm966_vm12, %v955_v36 }
 0x3b1   : > { %v982_v39 = vpop.f32.mrf.mxu1 }
 0x3b2   : > { %v1043_v40 = vmul.f32 0.35355338, %v982_v39  ;;  %v1001_v41 = vpop.f32.mrf.mxu0 }
 0x3b3   : > { %v1044_v43 = vmul.f32 0.35355338, %v1001_v41 }
 0x3b4   : > { %v1047_v42 = vadd.f32 %v1043_v40, %v3159_v38 }
 0x3b5   : > { %v1048_v17 = vadd.f32 %v1044_v43, %v3159_v38 }
 0x3b6   : > { %v1051_v44 = vsel %vm966_vm12, %v1047_v42, -inf  ;;  %v1039_v45 = vpop.f32.mrf.mxu3 }
 0x3b7   : > { %v1020_v46 = vpop.f32.mrf.mxu2  ;;  %1052 = vmax.xlane.f32.xlu0 %v1051_v44  ;;  %v1046_v47 = vmul.f32 0.35355338, %v1039_v45  ;;  %v1054_v54 = vsel %vm966_vm12, %v1048_v17, -inf }
 0x3b8   : > { %v1045_v48 = vmul.f32 0.35355338, %v1020_v46 }
 0x3b9   : > { %v984_v49 = vpop.f32.mrf.mxu1  ;;  %v1050_v50 = vadd.f32 %v1046_v47, %v3159_v38 }
 0x3ba   : > { %v1003_v51 = vpop.f32.mrf.mxu0  ;;  %v1049_v16 = vadd.f32 %v1045_v48, %v3159_v38 }
 0x3bb   : > { %v1060_v52 = vsel %vm966_vm12, %v1050_v50, -inf }
 0x3bc   : > { %v1057_v53 = vsel %vm966_vm12, %v1049_v16, -inf  ;;  %1061 = vmax.xlane.f32.xlu1 %v1060_v52 }
 0x3bd   : > { %1058 = vmax.xlane.f32.xlu2 %v1057_v53 }
 0x3be   : > { %v1041_v55 = vpop.f32.mrf.mxu3 }
 0x3bf   : > { %v1022_v57 = vpop.f32.mrf.mxu2  ;;  %1055 = vmax.xlane.f32.xlu0 %v1054_v54 }
 0x3d3   : > { %616 = vrot.lane.b32.xlu0 %v3044_v56, %s3698_s30 }
 0x3d5   : > { %610 = vrot.lane.b32.xlu2 %v3044_v56, %s3697_s14  ;;  %613 = vrot.lane.b32.xlu1 %v3044_v56, %s3696_s15 }
 0x42a   : > { %v1053_v59 = vpop.xlane.xlu0 %1052 }
 0x42b   : > { %v1063_v60 = vsub.f32 %v1047_v42, %v1053_v59 }
 0x42d   : > { %v1067_v61 = vmul.f32 1.442695, %v1063_v60 }
 0x42f   : > { %2812 = vpow2.f32 %v1067_v61  ;;  %v1062_v62 = vpop.xlane.xlu1 %1061 }
 0x430   : > { %v1059_v63 = vpop.xlane.xlu2 %1058  ;;  %v1066_v0 = vsub.f32 %v1050_v50, %v1062_v62 }
 0x431   : > { %v1065_v2 = vsub.f32 %v1049_v16, %v1059_v63 }
 0x432   : > { %v1073_v3 = vmul.f32 1.442695, %v1066_v0  ;;  %v1056_v4 = vpop.xlane.xlu0 %1055 }
 0x433   : > { %v1071_v5 = vmul.f32 1.442695, %v1065_v2  ;;  %v1064_v6 = vsub.f32 %v1048_v17, %v1056_v4 }
 0x434   : > { %2814 = vpow2.f32 %v1073_v3 }
 0x435   : > { %v3175_v7 = vpop.eup %2812  ;;  %2816 = vpow2.f32 %v1071_v5  ;;  %v1069_v8 = vmul.f32 1.442695, %v1064_v6 }
 0x436   : > { %v1075_v56 = vsel %vm966_vm12, %v3175_v7, 0.0 }
 0x437   : > { %1076 = vadd.xlane.f32.xlu1 %v1075_v56  ;;  %2818 = vpow2.f32 %v1069_v8 }
 0x438   : > { %v611_v14 = vpop.permute.xlu2 %610 }
 0x439   : > { %v746_v15 = vrot.slane %v611_v14, 4 }
 0x43a   : > { %v3179_v9 = vpop.eup %2814 }
 0x43b   : > { %v3181_v10 = vpop.eup %2816  ;;  %v1084_v11 = vsel %vm966_vm12, %v3179_v9, 0.0 }
 0x43c   : > { %v1081_v12 = vsel %vm966_vm12, %v3181_v10, 0.0  ;;  %1085 = vadd.xlane.f32.xlu2 %v1084_v11 }
 0x43d   : > { %1082 = vadd.xlane.f32.xlu0 %v1081_v12  ;;  %v3187_v13 = vpop.eup %2818 }
 0x43e   : > { %v1078_v18 = vsel %vm966_vm12, %v3187_v13, 0.0 }
 0x445   : > { %1079 = vadd.xlane.f32.xlu0 %v1078_v18  ;;  %v617_v19 = vpop.permute.xlu0 %616 }
 0x446   : > { %v744_v21 = vrot.slane %v617_v19, 4  ;;  %v747_v23 = vsel %vm620_vm11, %v617_v19, %v746_v15 }
 0x447   : > { %v755_v24 = vperm.slane %v747_v23, %v3062_v1  ;;  %v614_v25 = vpop.permute.xlu1 %613 }
 0x448   : > { %v745_v27 = vsel %vm620_vm11, %v744_v21, %v611_v14  ;;  %v732_v28 = vrot.slane %v614_v25, 4  ;;  %v735_v29 = vsel %vm620_vm11, %v614_v25, %v734_v20 }
 0x449   : > { %v751_v30 = vperm.slane %v745_v27, %v3062_v1  ;;  %v768_v31 = vrot.slane %v755_v24, 4  ;;  %v743_v32 = vperm.slane %v735_v29, %v3062_v1 }
 0x44a   : > { %v733_v33 = vsel %vm620_vm11, %v732_v28, %v608_v58 }
 0x44b   : > { %v756_v35 = vrot.slane %v751_v30, 4  ;;  %v739_v36 = vperm.slane %v733_v33, %v3062_v1  ;;  %v769_v37 = vsel %vm620_vm11, %v768_v31, %v743_v32  ;;  %v770_v39 = vrot.slane %v743_v32, 4 }
 0x44c   : > { %v775_v40 = vperm.slane %v769_v37, %v3073_v22 }
 0x44d   : > { %v757_v41 = vsel %vm620_vm11, %v756_v35, %v739_v36  ;;  %v758_v42 = vrot.slane %v739_v36, 4  ;;  %v771_v43 = vsel %vm620_vm11, %v755_v24, %v770_v39 }
 0x44e   : > { %v763_v44 = vperm.slane %v757_v41, %v3073_v22  ;;  %v779_v45 = vperm.slane %v771_v43, %v3073_v22  ;;  %v784_v48 = vrot.slane %v775_v40, 4 }
 0x44f   : > { %v759_v46 = vsel %vm620_vm11, %v751_v30, %v758_v42 }
 0x450   : > { %v767_v47 = vperm.slane %v759_v46, %v3073_v22  ;;  %v786_v49 = vrot.slane %v779_v45, 4  ;;  %v780_v50 = vrot.slane %v763_v44, 4  ;;  %v785_v55 = vsel %vm620_vm11, 0.0, %v784_v48 }
 0x452   : > { %v782_v51 = vrot.slane %v767_v47, 4  ;;  %v787_v16 = vsel %vm620_vm11, 0.0, %v786_v49  ;;  %v911_v17 = vsel %vm620_vm11, %v786_v49, %v775_v40  ;;  %v781_v62 = vsel %vm620_vm11, 0.0, %v780_v50 }
 0x453   : > { %v915_v52 = vperm.slane %v911_v17, %v3062_v1  ;;  %v916_v53 = vrot.slane %v787_v16, 4 }
 0x454   : > { %v783_v54 = vsel %vm620_vm11, 0.0, %v782_v51  ;;  %v900_v57 = vsel %vm620_vm11, %v782_v51, %v763_v44 }
 0x455   : > { %v905_v58 = vrot.slane %v783_v54, 4  ;;  %v917_v59 = vsel %vm620_vm11, %v916_v53, %v785_v55  ;;  %v936_v60 = vrot.slane %v915_v52, 4  ;;  %v904_v61 = vperm.slane %v900_v57, %v3062_v1 }
 0x456   : > { %v921_v63 = vperm.slane %v917_v59, %v3062_v1 }
 0x457   : > { %v906_v0 = vsel %vm620_vm11, %v905_v58, %v781_v62  ;;  %v924_v2 = vrot.slane %v904_v61, 4 }
 0x458   : > { %v934_v3 = vrot.slane %v921_v63, 4  ;;  %v910_v4 = vperm.slane %v906_v0, %v3062_v1  ;;  %v937_v5 = vsel %vm620_vm11, %v921_v63, %v936_v60 }
 0x459   : > { %v945_v6 = vperm.slane %v937_v5, %v3073_v22 }
 0x45a   : > { %v925_v56 = vsel %vm620_vm11, %v910_v4, %v924_v2  ;;  %v922_v8 = vrot.slane %v910_v4, 4  ;;  %v935_v11 = vsel %vm620_vm11, %v934_v3, %v915_v52 }
 0x45b   : > { %v933_v12 = vperm.slane %v925_v56, %v3073_v22  ;;  %v950_v14 = vrot.slane %v945_v6, 4  ;;  %v941_v15 = vperm.slane %v935_v11, %v3073_v22 }
 0x45c   : > { %v923_v18 = vsel %vm620_vm11, %v922_v8, %v904_v61 }
 0x45d   : > { %v951_v19 = vsel %vm620_vm11, %v950_v14, %v933_v12  ;;  %v929_v20 = vperm.slane %v923_v18, %v3073_v22  ;;  %v946_v21 = vrot.slane %v941_v15, 4  ;;  %v952_v23 = vrot.slane %v933_v12, 4 }
 0x45e   : > { %v964_v24 = vpack.c.bf16 %v951_v19, %v951_v19 }
 0x45f   : > { %v947_v25 = vsel %vm620_vm11, %v946_v21, %v929_v20  ;;  %v953_v27 = vsel %vm620_vm11, %v945_v6, %v952_v23  ;;  %v948_v28 = vrot.slane %v929_v20, 4 }
 0x460   : > { %v1141_v29 = vsel %vm492_vm0, %v964_v24, 0  ;;  %v962_v30 = vpack.c.bf16 %v947_v25, %v947_v25  ;;  %v965_v31 = vpack.c.bf16 %v953_v27, %v953_v27 }
 0x461   : > { %1150 = vmatpush.bf16.msra.mxu2 %v1141_v29  ;;  %v949_v32 = vsel %vm620_vm11, %v941_v15, %v948_v28 }
 0x462   : > { %v1103_v33 = vsel %vm492_vm0, %v962_v30, 0  ;;  %v1160_v35 = vsel %vm492_vm0, %v965_v31, 0  ;;  %v963_v36 = vpack.c.bf16 %v949_v32, %v949_v32 }
 0x463   : > { %1112 = vmatpush.bf16.msra.mxu0 %v1103_v33  ;;  %1169 = vmatpush.bf16.msrb.mxu3 %v1160_v35 }
 0x464   : > { %v1122_v37 = vsel %vm492_vm0, %v963_v36, 0 }
 0x465   : > { %1131 = vmatpush.bf16.msra.mxu1 %v1122_v37 }
 0x4aa   : > { %v1077_v39 = vpop.xlane.xlu1 %1076 }
 0x4ab   : > { %2820 = vrcp.f32 %v1077_v39 }
 0x4af   : > { %v1086_v40 = vpop.xlane.xlu2 %1085 }
 0x4b0   : > { %v1083_v41 = vpop.xlane.xlu0 %1082  ;;  %2822 = vrcp.f32 %v1086_v40 }
 0x4b1   : > { %v2821_v42 = vpop.eup %2820  ;;  %2824 = vrcp.f32 %v1083_v41 }
 0x4b2   : > { %v1091_v43 = vmul.f32 %v2821_v42, %v3175_v7 }
 0x4b4   : > { %v1095_v44 = vpack.c.bf16 %v1091_v43, %v1091_v43 }
 0x4b6   : > { %v2823_v45 = vpop.eup %2822  ;;  %2587 = vmatmul.msk.bf16.vlgmr.msra.gmra.mxu0 %vm966_vm12, %v1095_v44 }
 0x4b7   : > { %v2825_v46 = vpop.eup %2824  ;;  %v1094_v47 = vmul.f32 %v2823_v45, %v3179_v9 }
 0x4b8   : > { %v1093_v48 = vmul.f32 %v2825_v46, %v3181_v10  ;;  %v1080_v49 = vpop.xlane.xlu0 %1079 }
 0x4b9   : > { %2826 = vrcp.f32 %v1080_v49  ;;  %v1098_v50 = vpack.c.bf16 %v1094_v47, %v1094_v47 }
 0x4ba   : > { %v1097_v51 = vpack.c.bf16 %v1093_v48, %v1093_v48 }
 0x4bb   : > { %2590 = vmatmul.msk.bf16.vlgmr.msrb.gmra.mxu3 %vm966_vm12, %v1098_v50 }
 0x4bc   : > { %2589 = vmatmul.msk.bf16.vlgmr.msra.gmra.mxu2 %vm966_vm12, %v1097_v51 }
 0x4bf   : > { %v2827_v16 = vpop.eup %2826 }
 0x4c0   : > { %v1092_v7 = vmul.f32 %v2827_v16, %v3187_v13 }
 0x4c2   : > { %v1096_v17 = vpack.c.bf16 %v1092_v7, %v1092_v7 }
 0x4c4   : > { %2588 = vmatmul.msk.bf16.vlgmr.msra.gmra.mxu1 %vm966_vm12, %v1096_v17 }
 0x533   : > { %v1114_v52 = vpop.f32.mrf.mxu0 }
 0x534   : > { %v1177_v54 = vrot.slane %v1114_v52, 4 }
 0x53b   : > { %v1116_v53 = vpop.f32.mrf.mxu0 }
 0x53e   : > { %v1171_v9 = vpop.f32.mrf.mxu3 }
 0x53f   : > { %v1152_v55 = vpop.f32.mrf.mxu2  ;;  %v1187_v10 = vrot.slane %v1171_v9, 4 }
 0x540   : > { %v1175_v57 = vrot.slane %v1152_v55, 4  ;;  %v1178_v58 = vsel %vm620_vm11, %v1152_v55, %v1177_v54 }
 0x541   : > { %v1186_v59 = vperm.slane %v1178_v58, %v3062_v1  ;;  %v1133_v60 = vpop.f32.mrf.mxu1 }
 0x542   : > { %v1176_v61 = vsel %vm620_vm11, %v1175_v57, %v1114_v52  ;;  %v1189_v62 = vrot.slane %v1133_v60, 4  ;;  %v1188_v13 = vsel %vm620_vm11, %v1187_v10, %v1133_v60 }
 0x543   : > { %v1182_v63 = vperm.slane %v1176_v61, %v3062_v1  ;;  %v1194_v0 = vperm.slane %v1188_v13, %v3062_v1  ;;  %v1213_v4 = vrot.slane %v1186_v59, 4  ;;  %v2745_v13 = vld [vmem:[%s3687_s5] sm:$0xff] }
 0x544   : > { %v1190_v2 = vsel %vm620_vm11, %v1171_v9, %v1189_v62  ;;  %v2746_v62 = vld [vmem:[%s3687_s5 + $0x8] sm:$0xff] }
 0x545   : > { %v1201_v3 = vrot.slane %v1182_v63, 4  ;;  %v1198_v5 = vperm.slane %v1190_v2, %v3062_v1  ;;  %v1199_v6 = vrot.slane %v1194_v0, 4  ;;  %1327 = vmatpush.bf16.msrb.mxu0 %v2746_v62 }
 0x546   : > { %v1173_v56 = vpop.f32.mrf.mxu3 }
 0x547   : > { %v1200_v8 = vsel %vm620_vm11, %v1199_v6, %v1182_v63  ;;  %v1202_v11 = vsel %vm620_vm11, %v1194_v0, %v1201_v3  ;;  %v1211_v12 = vrot.slane %v1198_v5, 4  ;;  %v1214_v14 = vsel %vm620_vm11, %v1198_v5, %v1213_v4  ;;  %v1154_v15 = vpop.f32.mrf.mxu2  ;;  %v2801_v56 = vld [vmem:[%s3688_s6] ss:$0 sm:$0xff] }
 0x548   : > { %v1206_v18 = vperm.slane %v1200_v8, %v3073_v22  ;;  %v1210_v19 = vperm.slane %v1202_v11, %v3073_v22  ;;  %v1222_v20 = vperm.slane %v1214_v14, %v3073_v22 }
 0x549   : > { %v1212_v21 = vsel %vm620_vm11, %v1211_v12, %v1186_v59  ;;  %v1135_v23 = vpop.f32.mrf.mxu1  ;;  %1328 = vmatpush.bf16.msrb.mxu0 %v2745_v13 }
 0x54a   : > { %v1218_v24 = vperm.slane %v1212_v21, %v3073_v22  ;;  %v1223_v25 = vrot.slane %v1206_v18, 4  ;;  %v1225_v27 = vrot.slane %v1210_v19, 4  ;;  %v1229_v28 = vrot.slane %v1222_v20, 4 }
 0x54c   : > { %v1226_v29 = vsel %vm620_vm11, 0.0, %v1225_v27  ;;  %v1227_v30 = vrot.slane %v1218_v24, 4  ;;  %v1230_v31 = vsel %vm620_vm11, 0.0, %v1229_v28  ;;  %v1242_v32 = vsel %vm620_vm11, %v1229_v28, %v1218_v24  ;;  %v2747_v24 = vld [vmem:[%s3689_s7] sm:$0xff] }
 0x54d   : > { %v1236_v33 = vrot.slane %v1226_v29, 4  ;;  %v1247_v35 = vrot.slane %v1230_v31, 4  ;;  %v1224_v36 = vsel %vm620_vm11, 0.0, %v1223_v25  ;;  %v1231_v37 = vsel %vm620_vm11, %v1225_v27, %v1206_v18  ;;  %v2756_v25 = vld [vmem:[%s3691_s9 + $0x38] sm:$0xff]  ;;  %v2755_v27 = vld [vmem:[%s3691_s9 + $0x30] sm:$0xff] }
 0x54e   : > { %v1228_v39 = vsel %vm620_vm11, 0.0, %v1227_v30  ;;  %v1235_v40 = vperm.slane %v1231_v37, %v3062_v1  ;;  %v1246_v41 = vperm.slane %v1242_v32, %v3062_v1  ;;  %1473 = vmatpush.bf16.msrb.mxu2 %v2756_v25 }
 0x54f   : > { %v1237_v42 = vsel %vm620_vm11, %v1236_v33, %v1224_v36  ;;  %v1248_v43 = vsel %vm620_vm11, %v1247_v35, %v1228_v39 }
 0x550   : > { %v1241_v44 = vperm.slane %v1237_v42, %v3062_v1  ;;  %v1252_v45 = vperm.slane %v1248_v43, %v3062_v1  ;;  %v1255_v46 = vrot.slane %v1235_v40, 4  ;;  %v1267_v47 = vrot.slane %v1246_v41, 4  ;;  %v2754_v42 = vld [vmem:[%s3691_s9 + $0x28] sm:$0xff]  ;;  %v2753_v43 = vld [vmem:[%s3691_s9 + $0x20] sm:$0xff] }
 0x552   : > { %v1256_v48 = vsel %vm620_vm11, %v1241_v44, %v1255_v46  ;;  %v1268_v49 = vsel %vm620_vm11, %v1252_v45, %v1267_v47  ;;  %v1253_v50 = vrot.slane %v1241_v44, 4  ;;  %v1265_v51 = vrot.slane %v1252_v45, 4  ;;  %1474 = vmatpush.bf16.msrb.mxu2 %v2755_v27  ;;  %v2752_v44 = vld [vmem:[%s3691_s9 + $0x18] sm:$0xff]  ;;  %v2751_v45 = vld [vmem:[%s3691_s9 + $0x10] sm:$0xff]  ;;  %v2750_v46 = vld [vmem:[%s3691_s9 + $0x8] sm:$0xff] }
 0x553   : > { %v1264_v16 = vperm.slane %v1256_v48, %v3073_v22  ;;  %v1276_v7 = vperm.slane %v1268_v49, %v3073_v22  ;;  %v2749_v47 = vld [vmem:[%s3691_s9] sm:$0xff] }
 0x554   : > { %v1254_v17 = vsel %vm620_vm11, %v1253_v50, %v1235_v40  ;;  %v1266_v52 = vsel %vm620_vm11, %v1265_v51, %v1246_v41  ;;  %v2802_v48 = vld [vmem:[%s3690_s8] ss:$0 sm:$0xff] }
 0x555   : > { %v1283_v53 = vrot.slane %v1264_v16, 4  ;;  %v1281_v54 = vrot.slane %v1276_v7, 4  ;;  %v1260_v9 = vperm.slane %v1254_v17, %v3073_v22  ;;  %v1272_v55 = vperm.slane %v1266_v52, %v3073_v22 }
 0x556   : > { %1475 = vmatpush.bf16.msrb.mxu2 %v2754_v42 }
 0x557   : > { %v1284_v10 = vsel %vm620_vm11, %v1276_v7, %v1283_v53  ;;  %v1282_v57 = vsel %vm620_vm11, %v1281_v54, %v1264_v16  ;;  %v1277_v58 = vrot.slane %v1272_v55, 4  ;;  %v1279_v59 = vrot.slane %v1260_v9, 4 }
 0x558   : > { %1294 = vrot.lane.b32.xlu1 %v1284_v10, %s3700_s16  ;;  %1290 = vrot.lane.b32.xlu2 %v1282_v57, %s3701_s17  ;;  %s3705_s17 = smov 96  }
 0x559   : > { %v1280_v60 = vsel %vm620_vm11, %v1272_v55, %v1279_v59  ;;  %v1278_v61 = vsel %vm620_vm11, %v1277_v58, %v1260_v9  ;;  %v2803_v58 = vld [vmem:[%s3692_s10] ss:$0 sm:$0xff] }
 0x55a   : > { %1286 = vrot.lane.b32.xlu0 %v1280_v60, %s3699_s18  ;;  %1476 = vmatpush.bf16.msrb.mxu2 %v2753_v43  ;;  %s3706_s18 = smov 72  }
 0x55e   : > { %1477 = vmatpush.bf16.msrb.mxu2 %v2752_v44 }
 0x562   : > { %1478 = vmatpush.bf16.msrb.mxu2 %v2751_v45 }
 0x566   : > { %1479 = vmatpush.bf16.msrb.mxu2 %v2750_v46 }
 0x56a   : > { %1480 = vmatpush.bf16.msrb.mxu2 %v2749_v47 }
 0x5b2   : > { %v1291_v0 = vpop.permute.xlu2 %1290 }
 0x5ca   : > { %v1295_v3 = vpop.permute.xlu1 %1294 }
 0x5cc   : > { %v1287_v63 = vpop.permute.xlu0 %1286 }
 0x5cd   : > { %v1297_v2 = vsel %vm966_vm12, %v1278_v61, %v1287_v63 }
 0x5ce   : > { %v1298_v4 = vsel %vm464_vm2, %v1297_v2, %v1291_v0 }
 0x5cf   : > { %v1300_v5 = vsel %vm1299_vm13, %v1298_v4, %v1295_v3 }
 0x5d0   : > { %v1301_v6 = vpack.c.bf16 %v1300_v5, %v1300_v5  ;;  %v2758_v5 = vld [vmem:[%s3685_s3 + $0x18] sm:$0xff] }
 0x5d1   : > { %1546 = vmatpush.bf16.msra.mxu3 %v2758_v5 }
 0x5d2   : > { %2599 = vmatmul.msk.bf16.vlgmr.msrb.gmra.mxu0 %vm518_vm6, %v1301_v6  ;;  %v2757_v6 = vld [vmem:[%s3685_s3 + $0x10] sm:$0xff] }
 0x5d5   : > { %1547 = vmatpush.bf16.msra.mxu3 %v2757_v6 }
 0x64f   : > { %v1330_v8 = vpop.f32.mrf.mxu0 }
 0x650   : > { %v1334_v11 = vadd.f32 %v1330_v8, %v3024_v26  ;;  %v2748_v26 = vld [vmem:[%s3689_s7 + $0x8] sm:$0xff] }
 0x651   : > { %1392 = vmatpush.bf16.msrb.mxu1 %v2748_v26 }
 0x652   : > { %v3300_v12 = vadd.f32 %v2801_v56, %v1334_v11 }
 0x654   : > { %v1340_v14 = vsel %vm518_vm6, %v3300_v12, 0.0 }
 0x655   : > { %1341 = vadd.xlane.f32.xlu0 %v1340_v14  ;;  %1393 = vmatpush.bf16.msrb.mxu1 %v2747_v24  ;;  %v2804_v24 = vld [vmem:[%s3686_s4 + $0x1] ss:$0 sm:$0xff] }
 0x657   : > { %v1332_v15 = vpop.f32.mrf.mxu0 }
 0x6c8   : > { %v1342_v18 = vpop.xlane.xlu0 %1341 }
 0x6c9   : > { %v1343_v19 = vmul.f32 %v1342_v18, %v3028_v34 }
 0x6cb   : > { %v1344_v20 = vsub.f32 %v3300_v12, %v1343_v19 }
 0x6cd   : > { %v1345_v21 = vmul.f32 %v1344_v20, %v1344_v20 }
 0x6cf   : > { %v1346_v23 = vsel %vm518_vm6, %v1345_v21, 0.0 }
 0x6d0   : > { %1347 = vadd.xlane.f32.xlu2 %v1346_v23 }
 0x743   : > { %v1348_v28 = vpop.xlane.xlu2 %1347 }
 0x744   : > { %v1349_v29 = vmul.f32 %v1348_v28, %v3028_v34 }
 0x746   : > { %v1350_v30 = vadd.f32 1e-05, %v1349_v29 }
 0x748   : > { %2828 = vrsqrt.f32 %v1350_v30  ;;  %vm1357_vm15 = vweird.f32 %v1350_v30 }
 0x74e   : > { %v2829_v31 = vpop.eup %2828 }
 0x74f   : > { %v1352_v32 = vmul.f32 %v2829_v31, %v1350_v30  ;;  %vm1358_vm14 = vweird.f32 %v2829_v31 }
 0x750   : > { %vm1359_vm1 = vmor %vm1357_vm15, %vm1358_vm14 }
 0x751   : > { %v1353_v33 = vmul.f32 %v2829_v31, %v1352_v32 }
 0x753   : > { %v1354_v35 = vmul.f32 0.5, %v1353_v33 }
 0x755   : > { %v1355_v36 = vsub.f32 1.5, %v1354_v35 }
 0x757   : > { %v1356_v37 = vmul.f32 %v2829_v31, %v1355_v36 }
 0x759   : > { %v1360_v39 = vsel %vm1359_vm1, %v2829_v31, %v1356_v37 }
 0x75a   : > { %v1361_v40 = vmul.f32 %v1360_v39, %v1344_v20 }
 0x75c   : > { %v1362_v41 = vpack.c.bf16 %v1361_v40, %v1361_v40 }
 0x75e   : > { %2608 = vmatmul.msk.bf16.vlgmr.msrb.gmra.mxu1 %vm518_vm6, %v1362_v41 }
 0x7db   : > { %v1395_v49 = vpop.f32.mrf.mxu1 }
 0x7dc   : > { %v1396_v50 = vadd.f32 %v2802_v48, %v1395_v49 }
 0x7de   : > { %v1400_v51 = vmul.f32 0.044715, %v1396_v50  ;;  %v1399_v9 = vmul.f32 0.5, %v1396_v50 }
 0x7e0   : > { %v1401_v16 = vmul.f32 %v1400_v51, %v1396_v50 }
 0x7e2   : > { %v1402_v7 = vmul.f32 %v1401_v16, %v1396_v50 }
 0x7e3   : > { %v1397_v17 = vpop.f32.mrf.mxu1 }
 0x7e4   : > { %v1403_v52 = vadd.f32 %v1402_v7, %v1396_v50 }
 0x7e6   : > { %v1404_v53 = vmul.f32 0.7978846, %v1403_v52 }
 0x7e8   : > { %2830 = vtanh.f32 %v1404_v53 }
 0x7ee   : > { %v2831_v54 = vpop.eup %2830 }
 0x7ef   : > { %v1406_v55 = vadd.f32 1.0, %v2831_v54 }
 0x7f1   : > { %v1407_v10 = vmul.f32 %v1406_v55, %v1399_v9 }
 0x7f3   : > { %v1408_v57 = vpack.c.bf16 %v1407_v10, %v1407_v10 }
 0x7f5   : > { %1481 = vmatmul.bf16.vlgmr.msrb.gmra.mxu2 %v1408_v57 }
 0x878   : > { %v1482_v59 = vpop.f32.mrf.mxu2 }
 0x879   : > { %v1486_v60 = vadd.f32 %v1482_v59, %v3300_v12 }
 0x87b   : > { %v3346_v61 = vadd.f32 %v2803_v58, %v1486_v60 }
 0x87d   : > { %v1492_v62 = vsel %vm518_vm6, %v3346_v61, 0.0 }
 0x87e   : > { %1493 = vadd.xlane.f32.xlu1 %v1492_v62 }
 0x880   : > { %v1484_v13 = vpop.f32.mrf.mxu2 }
 0x8f1   : > { %v1494_v63 = vpop.xlane.xlu1 %1493 }
 0x8f2   : > { %v1495_v0 = vmul.f32 %v1494_v63, %v3028_v34 }
 0x8f4   : > { %v1496_v2 = vsub.f32 %v3346_v61, %v1495_v0 }
 0x8f6   : > { %v1497_v3 = vmul.f32 %v1496_v2, %v1496_v2 }
 0x8f8   : > { %v1498_v4 = vsel %vm518_vm6, %v1497_v3, 0.0 }
 0x8f9   : > { %1499 = vadd.xlane.f32.xlu0 %v1498_v4 }
 0x96c   : > { %v1500_v56 = vpop.xlane.xlu0 %1499 }
 0x96d   : > { %v1501_v8 = vmul.f32 %v1500_v56, %v3028_v34 }
 0x96f   : > { %v1502_v11 = vadd.f32 1e-05, %v1501_v8 }
 0x971   : > { %2832 = vrsqrt.f32 %v1502_v11  ;;  %vm1509_vm4 = vweird.f32 %v1502_v11 }
 0x977   : > { %v2833_v12 = vpop.eup %2832 }
 0x978   : > { %v1504_v14 = vmul.f32 %v2833_v12, %v1502_v11  ;;  %vm1510_vm3 = vweird.f32 %v2833_v12 }
 0x979   : > { %vm1511_vm5 = vmor %vm1509_vm4, %vm1510_vm3 }
 0x97a   : > { %v1505_v15 = vmul.f32 %v2833_v12, %v1504_v14 }
 0x97c   : > { %v1506_v18 = vmul.f32 0.5, %v1505_v15 }
 0x97e   : > { %v1507_v19 = vsub.f32 1.5, %v1506_v18 }
 0x980   : > { %v1508_v20 = vmul.f32 %v2833_v12, %v1507_v19 }
 0x982   : > { %v1512_v21 = vsel %vm1511_vm5, %v2833_v12, %v1508_v20 }
 0x983   : > { %v1513_v23 = vmul.f32 %v1512_v21, %v1496_v2 }
 0x985   : > { %v1514_v26 = vpack.c.bf16 %v1513_v23, %v1513_v23 }
 0x987   : > { %2654 = vmatmul.msk.bf16.vlgmr.msra.gmra.mxu3 %vm518_vm6, %v1514_v26 }
 0xa0a   : > { %v1549_v25 = vpop.f32.mrf.mxu3 }
 0xa0b   : > { %v3364_v27 = vadd.f32 %v2804_v24, %v1549_v25 }
 0xa0d   : > { %1566 = vrot.lane.b32.xlu1 %v3364_v27, %s2869_s22  ;;  %1560 = vrot.lane.b32.xlu0 %v3364_v27, %s2873_s28  ;;  %s3707_s22 = smov 64   ;;  %v1589_v37 = vrot.slane %v3364_v27, 4  ;;  %s3710_s28 = smov 48  }
 0xa0e   : > { %1554 = vrot.lane.b32.xlu2 %v3364_v27, %s2868_s21  ;;  %s3708_s21 = smov 40  }
 0xa12   : > { %v1551_v28 = vpop.f32.mrf.mxu3 }
 0xa15   : > { %1569 = vrot.lane.b32.xlu1 %v3364_v27, %s2874_s29  ;;  %1557 = vrot.lane.b32.xlu0 %v3364_v27, %s2871_s24  ;;  %s3709_s24 = smov 56   ;;  %s3711_s29 = smov 16  }
 0xa16   : > { %1563 = vrot.lane.b32.xlu2 %v3364_v27, %s3705_s17 }
 0xa1d   : > { %1572 = vrot.lane.b32.xlu0 %v3364_v27, %s3706_s18 }
 0xa25   : > { %1575 = vrot.lane.b32.xlu0 %v3364_v27, %s3707_s22 }
 0xa68   : > { %v1555_v29 = vpop.permute.xlu2 %1554 }
 0xa69   : > { %v1601_v32 = vrot.slane %v1555_v29, 4 }
 0xa70   : > { %v1564_v33 = vpop.permute.xlu2 %1563 }
 0xa71   : > { %v1613_v39 = vrot.slane %v1564_v33, 4 }
 0xa7f   : > { %v1567_v30 = vpop.permute.xlu1 %1566  ;;  %v1561_v31 = vpop.permute.xlu0 %1560 }
 0xa80   : > { %v1599_v35 = vrot.slane %v1561_v31, 4  ;;  %v1602_v36 = vsel %vm620_vm11, %v1561_v31, %v1601_v32  ;;  %v1625_v54 = vrot.slane %v1567_v30, 4 }
 0xa81   : > { %v1610_v46 = vperm.slane %v1602_v36, %v3062_v1 }
 0xa82   : > { %v1600_v42 = vsel %vm620_vm11, %v1599_v35, %v1555_v29 }
 0xa83   : > { %v1606_v50 = vperm.slane %v1600_v42, %v3062_v1  ;;  %v1647_v17 = vrot.slane %v1610_v46, 4 }
 0xa85   : > { %v1635_v55 = vrot.slane %v1606_v50, 4 }
 0xa87   : > { %v1570_v40 = vpop.permute.xlu1 %1569  ;;  %v1558_v41 = vpop.permute.xlu0 %1557 }
 0xa88   : > { %v1611_v43 = vrot.slane %v1570_v40, 4  ;;  %v1587_v44 = vrot.slane %v1558_v41, 4  ;;  %v1590_v45 = vsel %vm620_vm11, %v1558_v41, %v1589_v37  ;;  %v1614_v48 = vsel %vm620_vm11, %v1570_v40, %v1613_v39 }
 0xa89   : > { %v1598_v47 = vperm.slane %v1590_v45, %v3062_v1  ;;  %v1622_v52 = vperm.slane %v1614_v48, %v3062_v1 }
 0xa8a   : > { %v1588_v49 = vsel %vm620_vm11, %v1587_v44, %v3364_v27  ;;  %v1612_v16 = vsel %vm620_vm11, %v1611_v43, %v1564_v33 }
 0xa8b   : > { %v1594_v51 = vperm.slane %v1588_v49, %v3062_v1  ;;  %v1649_v7 = vrot.slane %v1598_v47, 4  ;;  %v1618_v10 = vperm.slane %v1612_v16, %v3062_v1  ;;  %v1648_v58 = vsel %vm620_vm11, %v1647_v17, %v1598_v47 }
 0xa8c   : > { %v1673_v63 = vrot.slane %v1622_v52, 4  ;;  %v1654_v4 = vperm.slane %v1648_v58, %v3073_v22 }
 0xa8d   : > { %v1637_v53 = vrot.slane %v1594_v51, 4  ;;  %v1650_v9 = vsel %vm620_vm11, %v1610_v46, %v1649_v7  ;;  %v1636_v0 = vsel %vm620_vm11, %v1635_v55, %v1594_v51  ;;  %v1661_v6 = vrot.slane %v1618_v10, 4 }
 0xa8e   : > { %v1658_v60 = vperm.slane %v1650_v9, %v3073_v22  ;;  %v1642_v12 = vperm.slane %v1636_v0, %v3073_v22  ;;  %v1693_v28 = vrot.slane %v1654_v4, 4 }
 0xa8f   : > { %v1638_v57 = vsel %vm620_vm11, %v1606_v50, %v1637_v53  ;;  %v1573_v59 = vpop.permute.xlu0 %1572 }
 0xa90   : > { %v1623_v62 = vrot.slane %v1573_v59, 4  ;;  %v1626_v13 = vsel %vm620_vm11, %v1573_v59, %v1625_v54  ;;  %v1646_v2 = vperm.slane %v1638_v57, %v3073_v22  ;;  %v1697_v14 = vrot.slane %v1658_v60, 4 }
 0xa91   : > { %v1634_v3 = vperm.slane %v1626_v13, %v3062_v1  ;;  %v1685_v31 = vrot.slane %v1642_v12, 4 }
 0xa92   : > { %v1624_v5 = vsel %vm620_vm11, %v1623_v62, %v1567_v30  ;;  %v1689_v18 = vrot.slane %v1646_v2, 4 }
 0xa93   : > { %v1630_v56 = vperm.slane %v1624_v5, %v3062_v1  ;;  %v1671_v8 = vrot.slane %v1634_v3, 4  ;;  %v1674_v11 = vsel %vm620_vm11, %v1634_v3, %v1673_v63 }
 0xa94   : > { %v1682_v15 = vperm.slane %v1674_v11, %v3073_v22 }
 0xa95   : > { %v1659_v19 = vrot.slane %v1630_v56, 4  ;;  %v1662_v20 = vsel %vm620_vm11, %v1630_v56, %v1661_v6  ;;  %v1672_v21 = vsel %vm620_vm11, %v1671_v8, %v1622_v52 }
 0xa96   : > { %v1670_v23 = vperm.slane %v1662_v20, %v3073_v22  ;;  %v1678_v26 = vperm.slane %v1672_v21, %v3073_v22  ;;  %v1695_v24 = vrot.slane %v1682_v15, 4  ;;  %v1698_v25 = vsel %vm620_vm11, %v1682_v15, %v1697_v14 }
 0xa97   : > { %v1660_v29 = vsel %vm620_vm11, %v1659_v19, %v1618_v10  ;;  %v1791_v30 = vrot.slane %v1698_v25, 4 }
 0xa98   : > { %v1666_v32 = vperm.slane %v1660_v29, %v3073_v22  ;;  %v1690_v33 = vsel %vm620_vm11, %v1670_v23, %v1689_v18  ;;  %v1691_v35 = vrot.slane %v1678_v26, 4  ;;  %v1687_v36 = vrot.slane %v1670_v23, 4 }
 0xa99   : > { %v1694_v37 = vsel %vm620_vm11, %v1678_v26, %v1693_v28  ;;  %v1696_v39 = vsel %vm620_vm11, %v1695_v24, %v1658_v60  ;;  %v1767_v40 = vrot.slane %v1690_v33, 4 }
 0xa9a   : > { %v1683_v41 = vrot.slane %v1666_v32, 4  ;;  %v1686_v42 = vsel %vm620_vm11, %v1666_v32, %v1685_v31  ;;  %v1692_v43 = vsel %vm620_vm11, %v1691_v35, %v1654_v4  ;;  %v1779_v44 = vrot.slane %v1696_v39, 4 }
 0xa9b   : > { %v1768_v45 = vsel %vm620_vm11, %v1767_v40, %v1686_v42  ;;  %v1769_v46 = vrot.slane %v1686_v42, 4  ;;  %v1781_v47 = vrot.slane %v1692_v43, 4  ;;  %v1792_v48 = vsel %vm620_vm11, %v1791_v30, %v1694_v37 }
 0xa9c   : > { %v1684_v49 = vsel %vm620_vm11, %v1683_v41, %v1642_v12  ;;  %v1774_v50 = vperm.slane %v1768_v45, %v3062_v1  ;;  %v1780_v51 = vsel %vm620_vm11, %v1779_v44, %v1692_v43  ;;  %v1793_v16 = vrot.slane %v1694_v37, 4 }
 0xa9d   : > { %v1782_v7 = vsel %vm620_vm11, %v1696_v39, %v1781_v47  ;;  %v1786_v17 = vperm.slane %v1780_v51, %v3062_v1  ;;  %v1798_v52 = vperm.slane %v1792_v48, %v3062_v1  ;;  %v1688_v53 = vsel %vm620_vm11, %v1687_v36, %v1646_v2 }
 0xa9e   : > { %v1794_v54 = vsel %vm620_vm11, %v1698_v25, %v1793_v16  ;;  %v1755_v9 = vrot.slane %v1688_v53, 4  ;;  %v1757_v55 = vrot.slane %v1684_v49, 4  ;;  %v1770_v10 = vsel %vm620_vm11, %v1690_v33, %v1769_v46 }
 0xa9f   : > { %v1802_v57 = vperm.slane %v1794_v54, %v3062_v1  ;;  %v1827_v58 = vrot.slane %v1798_v52, 4  ;;  %v1829_v59 = vrot.slane %v1786_v17, 4  ;;  %v1778_v60 = vperm.slane %v1770_v10, %v3062_v1 }
 0xaa0   : > { %v1758_v62 = vsel %vm620_vm11, %v1688_v53, %v1757_v55  ;;  %v1790_v13 = vperm.slane %v1782_v7, %v3062_v1  ;;  %v1756_v63 = vsel %vm620_vm11, %v1755_v9, %v1684_v49  ;;  %v1803_v0 = vrot.slane %v1774_v50, 4 }
 0xaa1   : > { %v1766_v2 = vperm.slane %v1758_v62, %v3062_v1  ;;  %v1815_v3 = vrot.slane %v1778_v60, 4  ;;  %v1839_v4 = vrot.slane %v1802_v57, 4  ;;  %v1762_v5 = vperm.slane %v1756_v63, %v3062_v1 }
 0xaa2   : > { %v1841_v6 = vrot.slane %v1790_v13, 4  ;;  %v1828_v56 = vsel %vm620_vm11, %v1827_v58, %v1786_v17  ;;  %v1830_v20 = vsel %vm620_vm11, %v1798_v52, %v1829_v59 }
 0xaa3   : > { %v1816_v8 = vsel %vm620_vm11, %v1815_v3, %v1766_v2  ;;  %v1840_v11 = vsel %vm620_vm11, %v1839_v4, %v1790_v13  ;;  %v1817_v12 = vrot.slane %v1766_v2, 4  ;;  %v1804_v14 = vsel %vm620_vm11, %v1803_v0, %v1762_v5 }
 0xaa4   : > { %v1822_v15 = vperm.slane %v1816_v8, %v3073_v22  ;;  %v1846_v18 = vperm.slane %v1840_v11, %v3073_v22  ;;  %v1842_v19 = vsel %vm620_vm11, %v1802_v57, %v1841_v6  ;;  %v1810_v26 = vperm.slane %v1804_v14, %v3073_v22 }
 0xaa5   : > { %v1818_v21 = vsel %vm620_vm11, %v1778_v60, %v1817_v12  ;;  %v1850_v23 = vperm.slane %v1842_v19, %v3073_v22  ;;  %v1805_v24 = vrot.slane %v1762_v5, 4  ;;  %v1834_v30 = vperm.slane %v1828_v56, %v3073_v22 }
 0xaa6   : > { %v1859_v25 = vrot.slane %v1846_v18, 4  ;;  %v1861_v28 = vrot.slane %v1822_v15, 4  ;;  %v1826_v29 = vperm.slane %v1818_v21, %v3073_v22  ;;  %v1838_v37 = vperm.slane %v1830_v20, %v3073_v22  ;;  %v1576_v20 = vpop.permute.xlu0 %1575 }
 0xaa7   : > { %v1863_v31 = vrot.slane %v1850_v23, 4  ;;  %v1806_v32 = vsel %vm620_vm11, %v1774_v50, %v1805_v24  ;;  %v1851_v44 = vrot.slane %v1834_v30, 4  ;;  %v1853_v45 = vrot.slane %v1810_v26, 4 }
 0xaa8   : > { %v1860_v33 = vsel %vm620_vm11, %v1859_v25, %v1822_v15  ;;  %v1862_v35 = vsel %vm620_vm11, %v1846_v18, %v1861_v28  ;;  %v1865_v36 = vrot.slane %v1826_v29, 4  ;;  %v1814_v49 = vperm.slane %v1806_v32, %v3073_v22 }
 0xaa9   : > { %v1925_v39 = vpack.c.bf16 %v1860_v33, %v1860_v33  ;;  %v1926_v40 = vpack.c.bf16 %v1862_v35, %v1862_v35  ;;  %v1864_v41 = vsel %vm620_vm11, %v1863_v31, %v1826_v29  ;;  %v1855_v51 = vrot.slane %v1838_v37, 4 }
 0xaaa   : > { %v1927_v42 = vpack.c.bf16 %v1864_v41, %v1864_v41  ;;  %v1866_v43 = vsel %vm620_vm11, %v1850_v23, %v1865_v36  ;;  %v1852_v7 = vsel %vm620_vm11, %v1851_v44, %v1810_v26  ;;  %v1854_v17 = vsel %vm620_vm11, %v1834_v30, %v1853_v45 }
 0xaab   : > { %v1937_v46 = vsel %vm966_vm12, %v1925_v39, 0  ;;  %v1956_v47 = vsel %vm966_vm12, %v1926_v40, 0  ;;  %v1928_v48 = vpack.c.bf16 %v1866_v43, %v1866_v43  ;;  %v1856_v52 = vsel %vm620_vm11, %v1855_v51, %v1814_v49 }
 0xaac   : > { %1946 = vmatpush.bf16.xpose.msra.mxu0 %v1937_v46  ;;  %1965 = vmatpush.bf16.xpose.msra.mxu1 %v1956_v47  ;;  %v1975_v50 = vsel %vm966_vm12, %v1927_v42, 0  ;;  %v1921_v53 = vpack.c.bf16 %v1852_v7, %v1852_v7  ;;  %v1922_v54 = vpack.c.bf16 %v1854_v17, %v1854_v17  ;;  %v1923_v9 = vpack.c.bf16 %v1856_v52, %v1856_v52 }
 0xaad   : > { %1984 = vmatpush.bf16.xpose.msrb.mxu3 %v1975_v50  ;;  %v1994_v16 = vsel %vm966_vm12, %v1928_v48, 0  ;;  %v1857_v55 = vrot.slane %v1814_v49, 4  ;;  %v1701_v43 = vrot.slane %v1576_v20, 4 }
 0xaaf   : > { %v1858_v10 = vsel %vm620_vm11, %v1838_v37, %v1857_v55 }
 0xab0   : > { %v1924_v57 = vpack.c.bf16 %v1858_v10, %v1858_v10 }
 0xab3   : > { %2655 = vmatmul.msk.bf16.vlgmr.msra.gmra.mxu0 %vm966_vm12, %v1921_v53  ;;  %2656 = vmatmul.msk.bf16.vlgmr.msra.gmra.mxu1 %vm966_vm12, %v1922_v54 }
 0xab4   : > { %2003 = vmatpush.bf16.xpose.msrb.mxu0 %v1994_v16  ;;  %2657 = vmatmul.msk.bf16.vlgmr.msrb.gmra.mxu3 %vm966_vm12, %v1923_v9 }
 0xac3   : > { %2658 = vmatmul.msk.bf16.vlgmr.msrb.gmra.mxu0 %vm966_vm12, %v1924_v57 }
 0xb30   : > { %v1948_v58 = vpop.f32.mrf.mxu0  ;;  %v1967_v59 = vpop.f32.mrf.mxu1 }
 0xb31   : > { %v2009_v60 = vmul.f32 0.35355338, %v1948_v58  ;;  %v2010_v62 = vmul.f32 0.35355338, %v1967_v59 }
 0xb33   : > { %v2013_v13 = vadd.f32 %v2009_v60, %v3159_v38  ;;  %v2014_v63 = vadd.f32 %v2010_v62, %v3159_v38 }
 0xb35   : > { %v2017_v0 = vsel %vm966_vm12, %v2013_v13, -inf  ;;  %v2020_v2 = vsel %vm966_vm12, %v2014_v63, -inf }
 0xb36   : > { %2018 = vmax.xlane.f32.xlu1 %v2017_v0  ;;  %2021 = vmax.xlane.f32.xlu0 %v2020_v2 }
 0xb37   : > { %v1986_v3 = vpop.f32.mrf.mxu3 }
 0xb38   : > { %v2011_v4 = vmul.f32 0.35355338, %v1986_v3  ;;  %v1950_v5 = vpop.f32.mrf.mxu0  ;;  %v1969_v6 = vpop.f32.mrf.mxu1 }
 0xb3a   : > { %v2015_v56 = vadd.f32 %v2011_v4, %v3159_v38 }
 0xb3c   : > { %v2023_v8 = vsel %vm966_vm12, %v2015_v56, -inf }
 0xb3d   : > { %2024 = vmax.xlane.f32.xlu2 %v2023_v8 }
 0xb3f   : > { %v1988_v11 = vpop.f32.mrf.mxu3 }
 0xb40   : > { %v2005_v12 = vpop.f32.mrf.mxu0 }
 0xb41   : > { %v2012_v14 = vmul.f32 0.35355338, %v2005_v12 }
 0xb43   : > { %v2016_v15 = vadd.f32 %v2012_v14, %v3159_v38 }
 0xb45   : > { %v2026_v18 = vsel %vm966_vm12, %v2016_v15, -inf }
 0xb46   : > { %2027 = vmax.xlane.f32.xlu2 %v2026_v18 }
 0xb48   : > { %v2007_v19 = vpop.f32.mrf.mxu0 }
 0xb4a   : > { %1584 = vrot.lane.b32.xlu0 %v3364_v27, %s3708_s21 }
 0xb4f   : > { %1578 = vrot.lane.b32.xlu1 %v3364_v27, %s3709_s24 }
 0xb5e   : > { %1581 = vrot.lane.b32.xlu2 %v3364_v27, %s3710_s28 }
 0xba9   : > { %v2019_v21 = vpop.xlane.xlu1 %2018  ;;  %v2022_v23 = vpop.xlane.xlu0 %2021 }
 0xbaa   : > { %v2029_v26 = vsub.f32 %v2013_v13, %v2019_v21  ;;  %v2030_v24 = vsub.f32 %v2014_v63, %v2022_v23 }
 0xbac   : > { %v2033_v25 = vmul.f32 1.442695, %v2029_v26  ;;  %v2035_v38 = vmul.f32 1.442695, %v2030_v24 }
 0xbae   : > { %2834 = vpow2.f32 %v2033_v25 }
 0xbaf   : > { %2836 = vpow2.f32 %v2035_v38 }
 0xbb0   : > { %v2025_v28 = vpop.xlane.xlu2 %2024 }
 0xbb1   : > { %v2031_v29 = vsub.f32 %v2015_v56, %v2025_v28 }
 0xbb3   : > { %v2037_v30 = vmul.f32 1.442695, %v2031_v29 }
 0xbb4   : > { %v3486_v31 = vpop.eup %2834 }
 0xbb5   : > { %v3488_v32 = vpop.eup %2836  ;;  %2838 = vpow2.f32 %v2037_v30  ;;  %v2041_v27 = vsel %vm966_vm12, %v3486_v31, 0.0 }
 0xbb6   : > { %2042 = vadd.xlane.f32.xlu0 %v2041_v27  ;;  %v2044_v33 = vsel %vm966_vm12, %v3488_v32, 0.0 }
 0xbb7   : > { %2045 = vadd.xlane.f32.xlu1 %v2044_v33 }
 0xbb9   : > { %v2028_v35 = vpop.xlane.xlu2 %2027 }
 0xbba   : > { %v2032_v36 = vsub.f32 %v2016_v15, %v2028_v35 }
 0xbbb   : > { %v3494_v37 = vpop.eup %2838 }
 0xbbc   : > { %v2039_v39 = vmul.f32 1.442695, %v2032_v36  ;;  %v1585_v40 = vpop.permute.xlu0 %1584  ;;  %v2047_v41 = vsel %vm966_vm12, %v3494_v37, 0.0 }
 0xbbd   : > { %2048 = vadd.xlane.f32.xlu2 %v2047_v41  ;;  %v1711_v42 = vrot.slane %v1585_v40, 4 }
 0xbbe   : > { %2840 = vpow2.f32 %v2039_v39 }
 0xbc1   : > { %v1579_v44 = vpop.permute.xlu1 %1578  ;;  %v1582_v45 = vpop.permute.xlu2 %1581 }
 0xbc2   : > { %v1712_v46 = vsel %vm620_vm11, %v1711_v42, %v1579_v44  ;;  %v1713_v47 = vrot.slane %v1579_v44, 4  ;;  %v1699_v48 = vrot.slane %v1582_v45, 4  ;;  %v1702_v49 = vsel %vm620_vm11, %v1582_v45, %v1701_v43 }
 0xbc3   : > { %v1718_v50 = vperm.slane %v1712_v46, %v3062_v1  ;;  %v1710_v51 = vperm.slane %v1702_v49, %v3062_v1 }
 0xbc4   : > { %v3502_v16 = vpop.eup %2840  ;;  %v1714_v7 = vsel %vm620_vm11, %v1585_v40, %v1713_v47  ;;  %v1700_v17 = vsel %vm620_vm11, %v1699_v48, %v1576_v20 }
 0xbc5   : > { %v1722_v52 = vperm.slane %v1714_v7, %v3062_v1  ;;  %v1723_v53 = vrot.slane %v1718_v50, 4  ;;  %v1706_v54 = vperm.slane %v1700_v17, %v3062_v1  ;;  %v1737_v9 = vrot.slane %v1710_v51, 4 }
 0xbc6   : > { %v2050_v55 = vsel %vm966_vm12, %v3502_v16, 0.0 }
 0xbc7   : > { %v1735_v10 = vrot.slane %v1722_v52, 4  ;;  %v1724_v57 = vsel %vm620_vm11, %v1723_v53, %v1706_v54  ;;  %v1725_v58 = vrot.slane %v1706_v54, 4  ;;  %v1738_v59 = vsel %vm620_vm11, %v1722_v52, %v1737_v9  ;;  %2051 = vadd.xlane.f32.xlu2 %v2050_v55 }
 0xbc8   : > { %v1730_v60 = vperm.slane %v1724_v57, %v3073_v22  ;;  %v1746_v62 = vperm.slane %v1738_v59, %v3073_v22 }
 0xbc9   : > { %v1726_v13 = vsel %vm620_vm11, %v1718_v50, %v1725_v58  ;;  %v1736_v63 = vsel %vm620_vm11, %v1735_v10, %v1710_v51 }
 0xbca   : > { %v1734_v0 = vperm.slane %v1726_v13, %v3073_v22  ;;  %v1742_v2 = vperm.slane %v1736_v63, %v3073_v22  ;;  %v1753_v3 = vrot.slane %v1746_v62, 4  ;;  %v1747_v4 = vrot.slane %v1730_v60, 4 }
 0xbcc   : > { %v1749_v5 = vrot.slane %v1734_v0, 4  ;;  %v1751_v6 = vrot.slane %v1742_v2, 4  ;;  %v1754_v56 = vsel %vm620_vm11, 0.0, %v1753_v3  ;;  %v1878_v8 = vsel %vm620_vm11, %v1753_v3, %v1742_v2 }
 0xbcd   : > { %v1883_v11 = vrot.slane %v1754_v56, 4  ;;  %v1882_v18 = vperm.slane %v1878_v8, %v3062_v1  ;;  %v1748_v23 = vsel %vm620_vm11, 0.0, %v1747_v4 }
 0xbce   : > { %v1750_v12 = vsel %vm620_vm11, 0.0, %v1749_v5  ;;  %v1752_v14 = vsel %vm620_vm11, 0.0, %v1751_v6  ;;  %v1867_v15 = vsel %vm620_vm11, %v1749_v5, %v1730_v60 }
 0xbcf   : > { %v1872_v19 = vrot.slane %v1750_v12, 4  ;;  %v1884_v20 = vsel %vm620_vm11, %v1883_v11, %v1752_v14  ;;  %v1871_v21 = vperm.slane %v1867_v15, %v3062_v1  ;;  %v1903_v24 = vrot.slane %v1882_v18, 4 }
 0xbd0   : > { %v1888_v26 = vperm.slane %v1884_v20, %v3062_v1 }
 0xbd1   : > { %v1873_v25 = vsel %vm620_vm11, %v1872_v19, %v1748_v23  ;;  %v1891_v38 = vrot.slane %v1871_v21, 4 }
 0xbd2   : > { %v1901_v28 = vrot.slane %v1888_v26, 4  ;;  %v1877_v29 = vperm.slane %v1873_v25, %v3062_v1  ;;  %v1904_v30 = vsel %vm620_vm11, %v1888_v26, %v1903_v24 }
 0xbd3   : > { %v1912_v27 = vperm.slane %v1904_v30, %v3073_v22 }
 0xbd4   : > { %v1892_v33 = vsel %vm620_vm11, %v1877_v29, %v1891_v38  ;;  %v1889_v35 = vrot.slane %v1877_v29, 4  ;;  %v1902_v36 = vsel %vm620_vm11, %v1901_v28, %v1882_v18 }
 0xbd5   : > { %v1900_v39 = vperm.slane %v1892_v33, %v3073_v22  ;;  %v1917_v40 = vrot.slane %v1912_v27, 4  ;;  %v1908_v41 = vperm.slane %v1902_v36, %v3073_v22 }
 0xbd6   : > { %v1890_v42 = vsel %vm620_vm11, %v1889_v35, %v1871_v21 }
 0xbd7   : > { %v1918_v43 = vsel %vm620_vm11, %v1917_v40, %v1900_v39  ;;  %v1896_v44 = vperm.slane %v1890_v42, %v3073_v22  ;;  %v1913_v45 = vrot.slane %v1908_v41, 4  ;;  %v1919_v46 = vrot.slane %v1900_v39, 4 }
 0xbd8   : > { %v1931_v47 = vpack.c.bf16 %v1918_v43, %v1918_v43 }
 0xbd9   : > { %v1914_v48 = vsel %vm620_vm11, %v1913_v45, %v1896_v44  ;;  %v1920_v49 = vsel %vm620_vm11, %v1912_v27, %v1919_v46  ;;  %v1915_v50 = vrot.slane %v1896_v44, 4 }
 0xbda   : > { %v2107_v51 = vsel %vm492_vm0, %v1931_v47, 0  ;;  %v1929_v7 = vpack.c.bf16 %v1914_v48, %v1914_v48  ;;  %v1932_v17 = vpack.c.bf16 %v1920_v49, %v1920_v49 }
 0xbdb   : > { %2116 = vmatpush.bf16.msra.mxu3 %v2107_v51  ;;  %v1916_v52 = vsel %vm620_vm11, %v1908_v41, %v1915_v50 }
 0xbdc   : > { %v2069_v53 = vsel %vm492_vm0, %v1929_v7, 0  ;;  %v2126_v54 = vsel %vm492_vm0, %v1932_v17, 0  ;;  %v1930_v9 = vpack.c.bf16 %v1916_v52, %v1916_v52 }
 0xbdd   : > { %2078 = vmatpush.bf16.msrb.mxu1 %v2069_v53  ;;  %2135 = vmatpush.bf16.msra.mxu0 %v2126_v54 }
 0xbde   : > { %v2088_v55 = vsel %vm492_vm0, %v1930_v9, 0 }
 0xbdf   : > { %2097 = vmatpush.bf16.msra.mxu2 %v2088_v55 }
 0xc29   : > { %v2043_v10 = vpop.xlane.xlu0 %2042 }
 0xc2a   : > { %2842 = vrcp.f32 %v2043_v10  ;;  %v2046_v57 = vpop.xlane.xlu1 %2045 }
 0xc2b   : > { %2844 = vrcp.f32 %v2046_v57 }
 0xc30   : > { %v2843_v58 = vpop.eup %2842  ;;  %v2049_v59 = vpop.xlane.xlu2 %2048 }
 0xc31   : > { %v2845_v60 = vpop.eup %2844  ;;  %v2057_v62 = vmul.f32 %v2843_v58, %v3486_v31  ;;  %2846 = vrcp.f32 %v2049_v59 }
 0xc32   : > { %v2058_v13 = vmul.f32 %v2845_v60, %v3488_v32 }
 0xc33   : > { %v2061_v63 = vpack.c.bf16 %v2057_v62, %v2057_v62 }
 0xc34   : > { %v2062_v0 = vpack.c.bf16 %v2058_v13, %v2058_v13 }
 0xc35   : > { %2659 = vmatmul.msk.bf16.vlgmr.msrb.gmra.mxu1 %vm966_vm12, %v2061_v63 }
 0xc36   : > { %2660 = vmatmul.msk.bf16.vlgmr.msra.gmra.mxu2 %vm966_vm12, %v2062_v0 }
 0xc37   : > { %v2847_v2 = vpop.eup %2846 }
 0xc38   : > { %v2059_v3 = vmul.f32 %v2847_v2, %v3494_v37 }
 0xc3a   : > { %v2063_v4 = vpack.c.bf16 %v2059_v3, %v2059_v3  ;;  %v2052_v5 = vpop.xlane.xlu2 %2051 }
 0xc3b   : > { %2848 = vrcp.f32 %v2052_v5 }
 0xc3c   : > { %2661 = vmatmul.msk.bf16.vlgmr.msra.gmra.mxu3 %vm966_vm12, %v2063_v4 }
 0xc41   : > { %v2849_v6 = vpop.eup %2848 }
 0xc42   : > { %v2060_v31 = vmul.f32 %v2849_v6, %v3502_v16 }
 0xc44   : > { %v2064_v56 = vpack.c.bf16 %v2060_v31, %v2060_v31 }
 0xc46   : > { %2662 = vmatmul.msk.bf16.vlgmr.msra.gmra.mxu0 %vm966_vm12, %v2064_v56 }
 0xcb2   : > { %v2080_v32 = vpop.f32.mrf.mxu1 }
 0xcb3   : > { %v2143_v12 = vrot.slane %v2080_v32, 4 }
 0xcb9   : > { %v2099_v8 = vpop.f32.mrf.mxu2 }
 0xcba   : > { %v2082_v11 = vpop.f32.mrf.mxu1  ;;  %v2155_v20 = vrot.slane %v2099_v8, 4 }
 0xcbf   : > { %v2118_v14 = vpop.f32.mrf.mxu3 }
 0xcc0   : > { %v2141_v15 = vrot.slane %v2118_v14, 4  ;;  %v2144_v18 = vsel %vm620_vm11, %v2118_v14, %v2143_v12 }
 0xcc1   : > { %v2152_v37 = vperm.slane %v2144_v18, %v3062_v1  ;;  %v2101_v19 = vpop.f32.mrf.mxu2 }
 0xcc2   : > { %v2142_v21 = vsel %vm620_vm11, %v2141_v15, %v2080_v32 }
 0xcc3   : > { %v2148_v23 = vperm.slane %v2142_v21, %v3062_v1  ;;  %v2179_v16 = vrot.slane %v2152_v37, 4  ;;  %v2137_v26 = vpop.f32.mrf.mxu0 }
 0xcc4   : > { %v2153_v24 = vrot.slane %v2137_v26, 4  ;;  %v2156_v25 = vsel %vm620_vm11, %v2137_v26, %v2155_v20  ;;  %v2760_v20 = vld [vmem:[%s3687_s5 + $0x18] sm:$0xff] }
 0xcc5   : > { %v2167_v38 = vrot.slane %v2148_v23, 4  ;;  %v2164_v28 = vperm.slane %v2156_v25, %v3062_v1  ;;  %2293 = vmatpush.bf16.msra.mxu1 %v2760_v20 }
 0xcc6   : > { %v2154_v29 = vsel %vm620_vm11, %v2153_v24, %v2099_v8 }
 0xcc7   : > { %v2160_v30 = vperm.slane %v2154_v29, %v3062_v1  ;;  %v2177_v27 = vrot.slane %v2164_v28, 4  ;;  %v2180_v33 = vsel %vm620_vm11, %v2164_v28, %v2179_v16  ;;  %v2120_v35 = vpop.f32.mrf.mxu3  ;;  %v2805_v28 = vld [vmem:[%s3688_s6 + $0x1] ss:$0 sm:$0xff] }
 0xcc8   : > { %v2188_v36 = vperm.slane %v2180_v33, %v3073_v22 }
 0xcc9   : > { %v2165_v39 = vrot.slane %v2160_v30, 4  ;;  %v2168_v40 = vsel %vm620_vm11, %v2160_v30, %v2167_v38  ;;  %v2178_v41 = vsel %vm620_vm11, %v2177_v27, %v2152_v37 }
 0xcca   : > { %v2176_v42 = vperm.slane %v2168_v40, %v3073_v22  ;;  %v2184_v43 = vperm.slane %v2178_v41, %v3073_v22  ;;  %v2195_v44 = vrot.slane %v2188_v36, 4 }
 0xccb   : > { %v2166_v45 = vsel %vm620_vm11, %v2165_v39, %v2148_v23  ;;  %v2139_v46 = vpop.f32.mrf.mxu0 }
 0xccc   : > { %v2172_v47 = vperm.slane %v2166_v45, %v3073_v22  ;;  %v2191_v48 = vrot.slane %v2176_v42, 4  ;;  %v2193_v49 = vrot.slane %v2184_v43, 4  ;;  %v2196_v50 = vsel %vm620_vm11, 0.0, %v2195_v44  ;;  %v2769_v45 = vld [vmem:[%s3691_s9 + $0x70] sm:$0xff] }
 0xccd   : > { %v2208_v51 = vsel %vm620_vm11, %v2195_v44, %v2184_v43  ;;  %v2213_v7 = vrot.slane %v2196_v50, 4  ;;  %v2761_v43 = vld [vmem:[%s3689_s7 + $0x10] sm:$0xff]  ;;  %v2770_v44 = vld [vmem:[%s3691_s9 + $0x78] sm:$0xff] }
 0xcce   : > { %v2189_v17 = vrot.slane %v2172_v47, 4  ;;  %v2192_v52 = vsel %vm620_vm11, 0.0, %v2191_v48  ;;  %v2194_v53 = vsel %vm620_vm11, 0.0, %v2193_v49  ;;  %v2212_v54 = vperm.slane %v2208_v51, %v3062_v1  ;;  %2443 = vmatpush.bf16.msrb.mxu3 %v2770_v44 }
 0xccf   : > { %v2202_v9 = vrot.slane %v2192_v52, 4  ;;  %v2197_v55 = vsel %vm620_vm11, %v2191_v48, %v2172_v47  ;;  %v2214_v10 = vsel %vm620_vm11, %v2213_v7, %v2194_v53 }
 0xcd0   : > { %v2190_v57 = vsel %vm620_vm11, 0.0, %v2189_v17  ;;  %v2201_v58 = vperm.slane %v2197_v55, %v3062_v1  ;;  %v2218_v59 = vperm.slane %v2214_v10, %v3062_v1  ;;  %v2233_v60 = vrot.slane %v2212_v54, 4  ;;  %v2768_v55 = vld [vmem:[%s3691_s9 + $0x68] sm:$0xff]  ;;  %v2767_v10 = vld [vmem:[%s3691_s9 + $0x60] sm:$0xff] }
 0xcd1   : > { %v2203_v62 = vsel %vm620_vm11, %v2202_v9, %v2190_v57  ;;  %v2766_v57 = vld [vmem:[%s3691_s9 + $0x58] sm:$0xff] }
 0xcd2   : > { %v2207_v13 = vperm.slane %v2203_v62, %v3062_v1  ;;  %v2221_v63 = vrot.slane %v2201_v58, 4  ;;  %v2234_v0 = vsel %vm620_vm11, %v2218_v59, %v2233_v60  ;;  %v2231_v2 = vrot.slane %v2218_v59, 4  ;;  %2444 = vmatpush.bf16.msrb.mxu3 %v2769_v45  ;;  %v2764_v59 = vld [vmem:[%s3691_s9 + $0x48] sm:$0xff]  ;;  %v2763_v60 = vld [vmem:[%s3691_s9 + $0x40] sm:$0xff] }
 0xcd3   : > { %v2242_v3 = vperm.slane %v2234_v0, %v3073_v22  ;;  %v2806_v62 = vld [vmem:[%s3690_s8 + $0x1] ss:$0 sm:$0xff] }
 0xcd4   : > { %v2222_v4 = vsel %vm620_vm11, %v2207_v13, %v2221_v63  ;;  %v2219_v5 = vrot.slane %v2207_v13, 4  ;;  %v2232_v6 = vsel %vm620_vm11, %v2231_v2, %v2212_v54 }
 0xcd5   : > { %v2230_v31 = vperm.slane %v2222_v4, %v3073_v22  ;;  %v2247_v56 = vrot.slane %v2242_v3, 4  ;;  %v2238_v32 = vperm.slane %v2232_v6, %v3073_v22 }
 0xcd6   : > { %v2220_v8 = vsel %vm620_vm11, %v2219_v5, %v2201_v58  ;;  %2445 = vmatpush.bf16.msrb.mxu3 %v2768_v55  ;;  %v2765_v58 = vld [vmem:[%s3691_s9 + $0x50] sm:$0xff] }
 0xcd7   : > { %v2248_v1 = vsel %vm620_vm11, %v2247_v56, %v2230_v31  ;;  %v2249_v11 = vrot.slane %v2230_v31, 4  ;;  %v2226_v12 = vperm.slane %v2220_v8, %v3073_v22  ;;  %v2243_v14 = vrot.slane %v2238_v32, 4  ;;  %v2759_v22 = vld [vmem:[%s3687_s5 + $0x10] sm:$0xff] }
 0xcd8   : > { %2256 = vrot.lane.b32.xlu0 %v2248_v1, %s3711_s29  ;;  %2294 = vmatpush.bf16.msra.mxu1 %v2759_v22  ;;  %s433_s29 = scalar_lea.vmem %s3695_s13, %s3715_s26 }
 0xcd9   : > { %v2250_v15 = vsel %vm620_vm11, %v2242_v3, %v2249_v11  ;;  %v2245_v18 = vrot.slane %v2226_v12, 4  ;;  %v2244_v37 = vsel %vm620_vm11, %v2243_v14, %v2226_v12  ;;  %v2807_v11 = vld [vmem:[%s3692_s10 + $0x1] ss:$0 sm:$0xff] }
 0xcda   : > { %2260 = vrot.lane.b32.xlu2 %v2250_v15, %s3712_s23  ;;  %2446 = vmatpush.bf16.msrb.mxu3 %v2767_v10 }
 0xcdb   : > { %v2246_v19 = vsel %vm620_vm11, %v2238_v32, %v2245_v18 }
 0xcdc   : > { %2252 = vrot.lane.b32.xlu1 %v2246_v19, %s3713_s27 }
 0xcde   : > { %2447 = vmatpush.bf16.msrb.mxu3 %v2766_v57 }
 0xce2   : > { %2448 = vmatpush.bf16.msrb.mxu3 %v2765_v58 }
 0xce6   : > { %2449 = vmatpush.bf16.msrb.mxu3 %v2764_v59 }
 0xcea   : > { %2450 = vmatpush.bf16.msrb.mxu3 %v2763_v60 }
 0xd34   : > { %v2261_v26 = vpop.permute.xlu2 %2260 }
 0xd4a   : > { %v2257_v23 = vpop.permute.xlu0 %2256 }
 0xd4e   : > { %v2253_v21 = vpop.permute.xlu1 %2252 }
 0xd4f   : > { %v2263_v16 = vsel %vm966_vm12, %v2244_v37, %v2253_v21  ;;  %vm2514_vm12 = vcmask 8192  }
 0xd50   : > { %v2264_v24 = vsel %vm464_vm2, %v2263_v16, %v2257_v23  ;;  %v2489_v16 = vld [vmem:[%s3693_s11 + $0x18] sm:$0xff] }
 0xd51   : > { %v2265_v25 = vsel %vm1299_vm13, %v2264_v24, %v2261_v26  ;;  %2506 = vmatpush.msrb.mxu0 %v2489_v16  ;;  %v2488_v26 = vld [vmem:[%s3693_s11 + $0x10] sm:$0xff]  ;;  %v2487_v24 = vld [vmem:[%s3693_s11 + $0x8] sm:$0xff] }
 0xd52   : > { %v2266_v38 = vpack.c.bf16 %v2265_v25, %v2265_v25  ;;  %v2486_v25 = vld [vmem:[%s3693_s11] sm:$0xff] }
 0xd53   : > { %2507 = vmatpush.msrb.mxu0 %v2488_v26 }
 0xd54   : > { %2675 = vmatmul.msk.bf16.vlgmr.msra.gmra.mxu1 %vm518_vm6, %v2266_v38 }
 0xd55   : > { %2508 = vmatpush.msrb.mxu0 %v2487_v24 }
 0xd57   : > { %2509 = vmatpush.msrb.mxu0 %v2486_v25 }
 0xdd1   : > { %v2296_v29 = vpop.f32.mrf.mxu1 }
 0xdd2   : > { %v2300_v30 = vadd.f32 %v2296_v29, %v3346_v61  ;;  %v2762_v61 = vld [vmem:[%s3689_s7 + $0x18] sm:$0xff] }
 0xdd3   : > { %2361 = vmatpush.bf16.msrb.mxu2 %v2762_v61 }
 0xdd4   : > { %v3611_v27 = vadd.f32 %v2805_v28, %v2300_v30 }
 0xdd6   : > { %v2307_v33 = vsel %vm518_vm6, %v3611_v27, 0.0 }
 0xdd7   : > { %2308 = vadd.xlane.f32.xlu0 %v2307_v33  ;;  %2362 = vmatpush.bf16.msrb.mxu2 %v2761_v43 }
 0xdd9   : > { %v2298_v35 = vpop.f32.mrf.mxu1 }
 0xe4a   : > { %v2309_v36 = vpop.xlane.xlu0 %2308 }
 0xe4b   : > { %v2310_v39 = vmul.f32 %v2309_v36, %v3028_v34 }
 0xe4d   : > { %v2311_v40 = vsub.f32 %v3611_v27, %v2310_v39 }
 0xe4f   : > { %v2312_v41 = vmul.f32 %v2311_v40, %v2311_v40 }
 0xe51   : > { %v2313_v42 = vsel %vm518_vm6, %v2312_v41, 0.0 }
 0xe52   : > { %2314 = vadd.xlane.f32.xlu1 %v2313_v42 }
 0xec5   : > { %v2315_v46 = vpop.xlane.xlu1 %2314 }
 0xec6   : > { %v2316_v47 = vmul.f32 %v2315_v46, %v3028_v34 }
 0xec8   : > { %v2317_v48 = vadd.f32 1e-05, %v2316_v47 }
 0xeca   : > { %2850 = vrsqrt.f32 %v2317_v48  ;;  %vm2324_vm2 = vweird.f32 %v2317_v48 }
 0xed0   : > { %v2851_v49 = vpop.eup %2850 }
 0xed1   : > { %v2319_v50 = vmul.f32 %v2851_v49, %v2317_v48  ;;  %vm2325_vm0 = vweird.f32 %v2851_v49 }
 0xed2   : > { %vm2326_vm7 = vmor %vm2324_vm2, %vm2325_vm0 }
 0xed3   : > { %v2320_v51 = vmul.f32 %v2851_v49, %v2319_v50 }
 0xed5   : > { %v2321_v7 = vmul.f32 0.5, %v2320_v51 }
 0xed7   : > { %v2322_v17 = vsub.f32 1.5, %v2321_v7 }
 0xed9   : > { %v2323_v52 = vmul.f32 %v2851_v49, %v2322_v17 }
 0xedb   : > { %v2327_v53 = vsel %vm2326_vm7, %v2851_v49, %v2323_v52 }
 0xedc   : > { %v2328_v54 = vmul.f32 %v2327_v53, %v2311_v40 }
 0xede   : > { %v2329_v9 = vpack.c.bf16 %v2328_v54, %v2328_v54 }
 0xee0   : > { %2690 = vmatmul.msk.bf16.vlgmr.msrb.gmra.mxu2 %vm518_vm6, %v2329_v9 }
 0xf63   : > { %v2364_v13 = vpop.f32.mrf.mxu2 }
 0xf64   : > { %v2365_v63 = vadd.f32 %v2806_v62, %v2364_v13 }
 0xf66   : > { %v2369_v0 = vmul.f32 0.044715, %v2365_v63  ;;  %v2368_v56 = vmul.f32 0.5, %v2365_v63 }
 0xf68   : > { %v2370_v2 = vmul.f32 %v2369_v0, %v2365_v63 }
 0xf6a   : > { %v2371_v3 = vmul.f32 %v2370_v2, %v2365_v63 }
 0xf6b   : > { %v2366_v4 = vpop.f32.mrf.mxu2 }
 0xf6c   : > { %v2372_v5 = vadd.f32 %v2371_v3, %v2365_v63 }
 0xf6e   : > { %v2373_v6 = vmul.f32 0.7978846, %v2372_v5 }
 0xf70   : > { %2852 = vtanh.f32 %v2373_v6 }
 0xf76   : > { %v2853_v31 = vpop.eup %2852 }
 0xf77   : > { %v2375_v32 = vadd.f32 1.0, %v2853_v31 }
 0xf79   : > { %v2376_v8 = vmul.f32 %v2375_v32, %v2368_v56 }
 0xf7b   : > { %v2377_v1 = vpack.c.bf16 %v2376_v8, %v2376_v8 }
 0xf7d   : > { %2451 = vmatmul.bf16.vlgmr.msrb.gmra.mxu3 %v2377_v1 }
0x1000   : > { %v2452_v12 = vpop.f32.mrf.mxu3 }
0x1001   : > { %v2456_v14 = vadd.f32 %v2452_v12, %v3611_v27 }
0x1003   : > { %v2462_v15 = vadd.f32 %v2807_v11, %v2456_v14 }
0x1005   : > { %v2464_v18 = vsel %vm2463_vm8, %v2462_v15, 0.0 }
0x1006   : > { %2465 = vadd.xlane.f32.xlu2 %v2464_v18 }
0x1008   : > { %v2454_v37 = vpop.f32.mrf.mxu3 }
0x1079   : > { %v2466_v19 = vpop.xlane.xlu2 %2465 }
0x107a   : > { %v2467_v20 = vmul.f32 %v2466_v19, %v3028_v34 }
0x107c   : > { %v2468_v22 = vsub.f32 %v2462_v15, %v2467_v20 }
0x107e   : > { %v2469_v21 = vmul.f32 %v2468_v22, %v2468_v22 }
0x1080   : > { %v2470_v23 = vsel %vm2463_vm8, %v2469_v21, 0.0 }
0x1081   : > { %2471 = vadd.xlane.f32.xlu0 %v2470_v23 }
0x10f4   : > { %v2472_v38 = vpop.xlane.xlu0 %2471 }
0x10f5   : > { %v2473_v28 = vmul.f32 %v2472_v38, %v3028_v34  ;;  %v2490_v34 = vld [vmem:[%s3694_s12] sm:$0x1] }
0x10f7   : > { %v2474_v29 = vadd.f32 1e-05, %v2473_v28 }
0x10f9   : > { %2854 = vrsqrt.f32 %v2474_v29  ;;  %vm2481_vm10 = vweird.f32 %v2474_v29 }
0x10ff   : > { %v2855_v30 = vpop.eup %2854 }
0x1100   : > { %v2476_v27 = vmul.f32 %v2855_v30, %v2474_v29  ;;  %vm2482_vm9 = vweird.f32 %v2855_v30 }
0x1101   : > { %vm2483_vm11 = vmor %vm2481_vm10, %vm2482_vm9 }
0x1102   : > { %v2477_v33 = vmul.f32 %v2855_v30, %v2476_v27 }
0x1104   : > { %v2478_v35 = vmul.f32 0.5, %v2477_v33 }
0x1106   : > { %v2479_v36 = vsub.f32 1.5, %v2478_v35 }
0x1108   : > { %v2480_v39 = vmul.f32 %v2855_v30, %v2479_v36 }
0x110a   : > { %v2484_v40 = vsel %vm2483_vm11, %v2855_v30, %v2480_v39 }
0x110b   : > { %v2485_v41 = vmul.f32 %v2484_v40, %v2468_v22 }
0x110d   : > { %2740 = vmatmul.msk.f32.vlgmr.msrb.gmra.mxu0 %vm518_vm6, %v2485_v41 }
0x118a   : > { %v2511_v42 = vpop.f32.mrf.mxu0 }
0x118b   : > { %v2512_v61 = vadd.f32 %v2511_v42, %v2490_v34 }
0x118d   : > { %2515 = vst.msk [vmem:[%s433_s29] sm:$0x1] %vm2514_vm12, %v2512_v61 }
0x118e PF: > { %s23_s25 = sadd.s32 1, %s2862_s25  }
0x118f   : > { %p20_p4 = scmp.ge.s32.totalorder %s23_s25, 4  }
0x1191   :  { %22 = sbr.rel (!%p20_p4) target bundleno = 1 (0x1), region = 110 }

</bundles_post_ra>
